<compile_context>
chip_gen: v5e
topology: v5e:2x2
jax: 0.10.0
libtpu: 0.0.40
codegen_flags: <defaults>
</compile_context>

<pallas_src>
import numpy as np
import jax
import jax.numpy as jnp
from jax.experimental import pallas as pl
from jax.experimental.pallas import tpu as pltpu


def _leaky_relu(x, slope=0.01):
    return jnp.where(x >= 0, x, slope * x)


def _round_up(x, m):
    return ((x + m - 1) // m) * m


# ------------------------- fused LSTM + MLP kernel ---------------------------
def make_fused_kernel(num_layers, seq_len, seq_out, b_pad, hidden):
    """Ref order:
       x2d, emb2d, w_ih0, w_hh0, b0, (w_ih_l, w_hh_l, b_l)*, w1e, w1h, b1, w2, b2,
       w3t, b3, out, pre_scratch, hout_scratch."""
    S, S_OUT, B, H = seq_len, seq_out, b_pad, hidden
    f32 = jnp.float32
    bf16 = jnp.bfloat16

    def kernel(*refs):
        it = iter(refs)
        x2d_ref = next(it)            # (S*B, Din)     bf16  shifted LSTM input, t-major
        emb2d_ref = next(it)          # (S_OUT*B, E)   bf16  unshifted event embeddings
        w_ih0_ref = next(it)          # (Din, 4H)      bf16
        w_hh0_ref = next(it)          # (H, 4H)        f32
        b0_ref = next(it)             # (1, 4H)        f32   (b_ih + b_hh)
        deep = [(next(it), next(it), next(it)) for _ in range(num_layers - 1)]
        w1e_ref = next(it); w1h_ref = next(it); b1_ref = next(it)
        w2_ref = next(it); b2_ref = next(it)
        w3t_ref = next(it); b3_ref = next(it)
        out_ref = next(it)            # (1, S_OUT*B)   lane-dense output row
        pre_ref = next(it)            # (S, B, 4H)     scratch: layer-0 projection
        hout_ref = next(it)           # (S_OUT, B, H)  scratch: top-layer h per step

        # (1) layer-0 input projection for ALL timesteps in one bf16 MXU call, bias
        #     folded in; the reshape to (S, B, 4H) is sublane-tile aligned (B % 8 == 0).
        proj = jnp.dot(x2d_ref[...], w_ih0_ref[...], preferred_element_type=f32)
        pre_ref[...] = (proj + b0_ref[...]).reshape(S, B, 4 * H)

        # zero the padded tail timesteps of hout (they only feed padded output lanes)
        if S_OUT > S:
            hout_ref[pl.ds(S, S_OUT - S), :, :] = jnp.zeros((S_OUT - S, B, H), f32)

        # hoist weight loads / bias broadcasts out of the serial time loop
        w_hh0 = w_hh0_ref[...]
        deep_w = [(wi[...], wh[...], jnp.broadcast_to(b[...], (B, 4 * H)))
                  for (wi, wh, b) in deep]

        def cell(gates, c_prev):
            # one sigmoid + one tanh over the whole (B, 4H) tile; PyTorch order i,f,g,o
            sig = jax.nn.sigmoid(gates)
            th = jnp.tanh(gates)
            i_g = sig[:, 0 * H:1 * H]
            f_g = sig[:, 1 * H:2 * H]
            o_g = sig[:, 3 * H:4 * H]
            g_g = th[:, 2 * H:3 * H]
            c_new = f_g * c_prev + i_g * g_g
            h_new = o_g * jnp.tanh(c_new)
            return h_new, c_new

        def step(t, carry):
            hs, cs, recs = carry          # recs[l] = hs[l] @ w_hh_l, issued last step
            h, c = cell(pre_ref[t] + recs[0], cs[0])
            new_hs, new_cs = [h], [c]
            # recurrent matmul for the NEXT step, issued immediately so it overlaps
            # the deeper layers of this step / the next step after unrolling.
            new_recs = [jnp.dot(h, w_hh0, preferred_element_type=f32)]
            x = h
            for l in range(1, num_layers):
                w_ih_l, w_hh_l, b_l = deep_w[l - 1]
                gates = jnp.dot(x, w_ih_l, preferred_element_type=f32) + recs[l] + b_l
                h, c = cell(gates, cs[l])
                new_recs.append(jnp.dot(h, w_hh_l, preferred_element_type=f32))
                new_hs.append(h)
                new_cs.append(c)
                x = h
                # TODO(synk): nn.LSTM inter-layer dropout (p=0.1) omitted (eval-mode semantics).
            hout_ref[t] = x
            return tuple(new_hs), tuple(new_cs), tuple(new_recs)

        zeros_h = tuple(jnp.zeros((B, H), f32) for _ in range(num_layers))
        zeros_c = tuple(jnp.zeros((B, H), f32) for _ in range(num_layers))
        zeros_r = tuple(jnp.zeros((B, 4 * H), f32) for _ in range(num_layers))
        # cap unroll: full unroll only for short S; partial unroll keeps the LLO window
        # full without bloating the instruction stream at production S.
        jax.lax.fori_loop(0, S, step, (zeros_h, zeros_c, zeros_r), unroll=min(S, 8))

        # (3) fused pre_linear MLP on the whole slab held in VMEM (bf16 MXU operands,
        #     f32 accumulation). Padded rows only feed padded / dropped output lanes.
        emb = emb2d_ref[...]                                             # bf16
        hout = hout_ref[...].reshape(S_OUT * B, H).astype(bf16)
        h1 = _leaky_relu(
            jnp.dot(emb, w1e_ref[...], preferred_element_type=f32)
            + jnp.dot(hout, w1h_ref[...], preferred_element_type=f32)
            + b1_ref[...])
        h2 = _leaky_relu(
            jnp.dot(h1.astype(bf16), w2_ref[...], preferred_element_type=f32)
            + b2_ref[...])
        # final layer as (1, F4) x (TB, F4)^T -> lane-dense, 128-aligned (1, TB) row
        y = jax.lax.dot_general(w3t_ref[...], h2,
                                dimension_numbers=(((1,), (1,)), ((), ())),
                                preferred_element_type=f32)
        out_ref[...] = _leaky_relu(y + b3_ref[...])

    return kernel


def fused_forward(x2d, emb2d, params, *, B_pad, S, S_out, H):
    num_layers = len(params["lstm"])
    TB_out = emb2d.shape[0]
    E = emb2d.shape[1]
    bf16 = jnp.bfloat16

    w_ih0, w_hh0, b0 = params["lstm"][0]
    args = [x2d, emb2d, w_ih0.astype(bf16), w_hh0, b0]
    for l in range(1, num_layers):
        w_ih, w_hh, b = params["lstm"][l]
        args += [w_ih, w_hh, b]       # kept separate: gates = x@w_ih + h_prev@w_hh + b

    w1, b1, w2, b2, w3, b3 = params["mlp"]
    args += [w1[:E, :].astype(bf16), w1[E:, :].astype(bf16), b1,
             w2.astype(bf16), b2, w3.T, b3]

    # every operand is 2-D and fully resident (grid=(1,)); bf16 streaming inputs halve DMA bytes
    in_specs = [pl.BlockSpec(a.shape, lambda i: (0, 0)) for a in args]

    # TODO(synk): production-scale S*B needs an S-chunked grid (carried h/c scratch,
    # streamed x2d/emb2d/hout, Buffered(1) on single-step inputs) and a core_parallel
    # batch split across v7x's two TensorCores; at these shapes the single-step
    # whole-slab design fits comfortably in VMEM.
    return pl.pallas_call(
        make_fused_kernel(num_layers, S, S_out, B_pad, H),
        out_shape=jax.ShapeDtypeStruct((1, TB_out), jnp.float32),
        grid=(1,),
        in_specs=in_specs,
        out_specs=pl.BlockSpec((1, TB_out), lambda i: (0, 0)),
        scratch_shapes=[pltpu.VMEM((S, B_pad, 4 * H), jnp.float32),
                        pltpu.VMEM((S_out, B_pad, H), jnp.float32)],
        compiler_params=pltpu.CompilerParams(
            dimension_semantics=("arbitrary",),
            # explicit limit: v5e's default scoped VMEM is only 16 MiB
            vmem_limit_bytes=32 * 1024 * 1024),
    )(*args)


# ------------------------------ full forward --------------------------------
def _packed_flat_indices(valid_len_np, row_stride):
    """pack_padded_sequence(..., enforce_sorted=False).data row order -> flat t*stride+b."""
    lengths = np.asarray(valid_len_np)
    sorted_idx = np.argsort(-lengths, kind="stable")
    flat = []
    for t in range(int(lengths.max())):
        for b in sorted_idx:
            if lengths[b] > t:
                flat.append(t * row_stride + int(b))
    return np.asarray(flat, np.int32)


def lstm_time_predictor_forward(params, input_time, input_events, valid_len_np):
    B, S = input_time.shape
    E = params["embed"].shape[1]
    H = params["lstm"][0][1].shape[0]
    B_pad = _round_up(B, 8)                       # 8-sublane aligned batch
    TB = S * B_pad
    lane_mult = int(np.lcm(128, B_pad))
    TB_out = _round_up(TB, lane_mult)             # 128-aligned lane-dense output width
    S_out = TB_out // B_pad

    # embed_layer (nn.Embedding-style lookup) — XLA glue.
    event_emb = jnp.take(params["embed"], input_events, axis=0)            # (B, S, E)

    # Shifted LSTM input; only the first S of the S+1 shifted timesteps are ever
    # consumed by pack_padded_sequence (valid_len <= S), so build exactly S.
    sos = jnp.broadcast_to(params["sos"].reshape(1, 1, E), (B, 1, E))
    shifted_emb = jnp.concatenate([sos, event_emb[:, :-1, :]], axis=1)     # (B, S, E)
    shifted_time = jnp.concatenate(
        [jnp.zeros((B, 1), jnp.float32), input_time[:, :-1]], axis=-1)[..., None]
    lstm_in = jnp.concatenate([shifted_emb, shifted_time], axis=-1)        # (B, S, E+1)

    # time-major, batch padded to B_pad sublanes, flattened row = t*B_pad + b
    x3 = jnp.pad(jnp.transpose(lstm_in, (1, 0, 2)), ((0, 0), (0, B_pad - B), (0, 0)))
    x2d = x3.reshape(TB, E + 1).astype(jnp.bfloat16)

    emb3 = jnp.pad(jnp.transpose(event_emb, (1, 0, 2)), ((0, 0), (0, B_pad - B), (0, 0)))
    emb2d = jnp.pad(emb3.reshape(TB, E), ((0, TB_out - TB), (0, 0))).astype(jnp.bfloat16)

    y = fused_forward(x2d, emb2d, params, B_pad=B_pad, S=S, S_out=S_out, H=H)  # (1, TB_out)

    # TODO(synk): host-side packing-index construction bakes valid_len as trace constants
    # (same data-dependent output shape as PyTorch's PackedSequence.data).
    flat_idx = jnp.asarray(_packed_flat_indices(valid_len_np, B_pad))
    return y[0, flat_idx]


# --------------------------- pure-JAX reference ------------------------------
def reference_forward(params, input_time, input_events, valid_len_np):
    B, S = input_time.shape
    E = params["embed"].shape[1]
    H = params["lstm"][0][1].shape[0]
    hp = jax.lax.Precision.HIGHEST

    event_emb = jnp.take(params["embed"], input_events, axis=0)
    sos = jnp.broadcast_to(params["sos"].reshape(1, 1, E), (B, 1, E))
    shifted_emb = jnp.concatenate([sos, event_emb[:, :-1, :]], axis=1)
    shifted_time = jnp.concatenate(
        [jnp.zeros((B, 1), jnp.float32), input_time[:, :-1]], axis=-1)[..., None]
    x = jnp.concatenate([shifted_emb, shifted_time], axis=-1)

    hs = [jnp.zeros((B, H), jnp.float32) for _ in params["lstm"]]
    cs = [jnp.zeros((B, H), jnp.float32) for _ in params["lstm"]]
    outs = []
    for t in range(S):
        xt = x[:, t, :]
        for l, (w_ih, w_hh, b) in enumerate(params["lstm"]):
            gates = (jnp.dot(xt, w_ih, precision=hp)
                     + jnp.dot(hs[l], w_hh, precision=hp) + b)
            i = jax.nn.sigmoid(gates[:, :H]); f = jax.nn.sigmoid(gates[:, H:2 * H])
            g = jnp.tanh(gates[:, 2 * H:3 * H]); o = jax.nn.sigmoid(gates[:, 3 * H:])
            cs[l] = f * cs[l] + i * g
            hs[l] = o * jnp.tanh(cs[l])
            xt = hs[l]
        outs.append(xt)
    h_all = jnp.stack(outs, axis=0)                                        # (S, B, H)

    lengths = np.asarray(valid_len_np)
    sorted_idx = np.argsort(-lengths, kind="stable")
    b_idx, t_idx = [], []
    for t in range(int(lengths.max())):
        for b in sorted_idx:
            if lengths[b] > t:
                b_idx.append(int(b)); t_idx.append(t)
    b_idx = np.asarray(b_idx); t_idx = np.asarray(t_idx)
    cat = jnp.concatenate([event_emb[b_idx, t_idx], h_all[t_idx, b_idx]], axis=-1)

    w1, b1, w2, b2, w3, b3 = params["mlp"]
    h1 = _leaky_relu(jnp.dot(cat, w1, precision=hp) + b1)
    h2 = _leaky_relu(jnp.dot(h1, w2, precision=hp) + b2)
    return _leaky_relu(jnp.dot(h2, w3, precision=hp) + b3)[:, 0]


# ------------------------------- parameters ---------------------------------
def init_params(key, vocab, input_size, lstm_hidden, fc_hidden, num_layers):
    keys = iter(jax.random.split(key, 32))

    def u(shape, scale=0.1):
        return jax.random.uniform(next(keys), shape, jnp.float32, -scale, scale)

    params = {}
    params["embed"] = u((vocab, input_size))
    params["sos"] = jnp.zeros((input_size,), jnp.float32)   # nn.Parameter(zeros)

    lstm_layers = []
    for l in range(num_layers):
        d_in = (1 + input_size) if l == 0 else lstm_hidden
        w_ih = u((d_in, 4 * lstm_hidden))
        w_hh = u((lstm_hidden, 4 * lstm_hidden))
        b = u((1, 4 * lstm_hidden)) + u((1, 4 * lstm_hidden))   # b_ih + b_hh
        lstm_layers.append((w_ih, w_hh, b))
    params["lstm"] = lstm_layers

    fc4 = fc_hidden // 4
    params["mlp"] = (
        u((lstm_hidden + input_size, fc_hidden)), u((1, fc_hidden)),
        u((fc_hidden, fc4)), u((1, fc4)),
        u((fc4, 1)), u((1, 1)),
    )
    return params


if __name__ == "__main__":
    # Small config consistent with the module
    vocab = 20
    input_size = 16        # embedding dim
    lstm_hidden = 32
    fc_hidden = 64
    num_layers = 2
    B, S = 2, 8

    key = jax.random.PRNGKey(0)
    k_p, k_t, k_e = jax.random.split(key, 3)

    params = init_params(k_p, vocab, input_size, lstm_hidden, fc_hidden, num_layers)

    valid_len_np = np.array([8, 5], dtype=np.int32)
    input_time = jax.random.uniform(k_t, (B, S), jnp.float32, 0.0, 5.0)
    # zero out padded positions (placeholders), as described in the docstring
    mask = (np.arange(S)[None, :] < valid_len_np[:, None]).astype(np.float32)
    input_time = input_time * jnp.asarray(mask)
    input_events = jax.random.randint(k_e, (B, S), 0, vocab, jnp.int32)

    out = lstm_time_predictor_forward(params, input_time, input_events, valid_len_np)
    out = jax.block_until_ready(out)
    assert out.shape == (int(valid_len_np.sum()),)

    ref = jax.block_until_ready(
        reference_forward(params, input_time, input_events, valid_len_np))
    # Tolerance relaxed vs the Precision.HIGHEST f32 reference because the slab
    # matmuls now use bf16 MXU operands (per performance review; f32 accumulation).
    np.testing.assert_allclose(np.asarray(out), np.asarray(ref), rtol=2e-2, atol=2e-3)

    print("KERNEL_OK")
</pallas_src>

<mosaic_0001>
module attributes {stable_mosaic.version = 11 : i64} {
  func.func @kernel(%arg0: i32, %arg1: memref<64x17xbf16, #tpu.memory_space<vmem>>, %arg2: memref<128x16xbf16, #tpu.memory_space<vmem>>, %arg3: memref<17x128xbf16, #tpu.memory_space<vmem>>, %arg4: memref<32x128xf32, #tpu.memory_space<vmem>>, %arg5: memref<1x128xf32, #tpu.memory_space<vmem>>, %arg6: memref<32x128xf32, #tpu.memory_space<vmem>>, %arg7: memref<32x128xf32, #tpu.memory_space<vmem>>, %arg8: memref<1x128xf32, #tpu.memory_space<vmem>>, %arg9: memref<16x64xbf16, #tpu.memory_space<vmem>>, %arg10: memref<32x64xbf16, #tpu.memory_space<vmem>>, %arg11: memref<1x64xf32, #tpu.memory_space<vmem>>, %arg12: memref<64x16xbf16, #tpu.memory_space<vmem>>, %arg13: memref<1x16xf32, #tpu.memory_space<vmem>>, %arg14: memref<1x16xf32, #tpu.memory_space<vmem>>, %arg15: memref<1x1xf32, #tpu.memory_space<vmem>>, %arg16: memref<1x128xf32, #tpu.memory_space<vmem>>, %arg17: memref<8x8x128xf32, #tpu.memory_space<vmem>>, %arg18: memref<16x8x32xf32, #tpu.memory_space<vmem>>) attributes {dimension_semantics = [#tpu.dimension_semantics<arbitrary>], iteration_bounds = array<i64: 1>, scalar_prefetch = 0 : i64, scratch_operands = 2 : i64, tpu.core_type = #tpu.core_type<tc>, window_params = [{pipeline_mode = #tpu.pipeline_mode<synchronous>, transform_indices = @transform_0, window_bounds = array<i64: 64, 17>}, {pipeline_mode = #tpu.pipeline_mode<synchronous>, transform_indices = @transform_1, window_bounds = array<i64: 128, 16>}, {pipeline_mode = #tpu.pipeline_mode<synchronous>, transform_indices = @transform_2, window_bounds = array<i64: 17, 128>}, {pipeline_mode = #tpu.pipeline_mode<synchronous>, transform_indices = @transform_3, window_bounds = array<i64: 32, 128>}, {pipeline_mode = #tpu.pipeline_mode<synchronous>, transform_indices = @transform_4, window_bounds = array<i64: 1, 128>}, {pipeline_mode = #tpu.pipeline_mode<synchronous>, transform_indices = @transform_5, window_bounds = array<i64: 32, 128>}, {pipeline_mode = #tpu.pipeline_mode<synchronous>, transform_indices = @transform_6, window_bounds = array<i64: 32, 128>}, {pipeline_mode = #tpu.pipeline_mode<synchronous>, transform_indices = @transform_7, window_bounds = array<i64: 1, 128>}, {pipeline_mode = #tpu.pipeline_mode<synchronous>, transform_indices = @transform_8, window_bounds = array<i64: 16, 64>}, {pipeline_mode = #tpu.pipeline_mode<synchronous>, transform_indices = @transform_9, window_bounds = array<i64: 32, 64>}, {pipeline_mode = #tpu.pipeline_mode<synchronous>, transform_indices = @transform_10, window_bounds = array<i64: 1, 64>}, {pipeline_mode = #tpu.pipeline_mode<synchronous>, transform_indices = @transform_11, window_bounds = array<i64: 64, 16>}, {pipeline_mode = #tpu.pipeline_mode<synchronous>, transform_indices = @transform_12, window_bounds = array<i64: 1, 16>}, {pipeline_mode = #tpu.pipeline_mode<synchronous>, transform_indices = @transform_13, window_bounds = array<i64: 1, 16>}, {pipeline_mode = #tpu.pipeline_mode<synchronous>, transform_indices = @transform_14, window_bounds = array<i64: 1, 1>}, {pipeline_mode = #tpu.pipeline_mode<synchronous>, transform_indices = @transform_15, window_bounds = array<i64: 1, 128>}]} {
    %c0 = arith.constant 0 : index
    %c0_0 = arith.constant 0 : index
    %0 = vector.load %arg1[%c0, %c0_0] : memref<64x17xbf16, #tpu.memory_space<vmem>>, vector<64x17xbf16>
    %c0_1 = arith.constant 0 : index
    %c0_2 = arith.constant 0 : index
    %1 = vector.load %arg3[%c0_1, %c0_2] : memref<17x128xbf16, #tpu.memory_space<vmem>>, vector<17x128xbf16>
    %cst = arith.constant dense<0.000000e+00> : vector<64x128xf32>
    %2 = tpu.matmul %0, %1, %cst {dimension_numbers = #tpu.dot_dimension_numbers<[1], [0], [0], [1], [0, 0, 1, 1], [], []>} : vector<64x17xbf16>, vector<17x128xbf16>, vector<64x128xf32> -> vector<64x128xf32>
    %c0_3 = arith.constant 0 : index
    %c0_4 = arith.constant 0 : index
    %3 = vector.load %arg5[%c0_3, %c0_4] : memref<1x128xf32, #tpu.memory_space<vmem>>, vector<1x128xf32>
    %4 = vector.broadcast %3 : vector<1x128xf32> to vector<64x128xf32>
    %5 = arith.addf %2, %4 : vector<64x128xf32>
    %6 = vector.shape_cast %5 : vector<64x128xf32> to vector<8x8x128xf32>
    %c0_5 = arith.constant 0 : index
    %c0_6 = arith.constant 0 : index
    %c0_7 = arith.constant 0 : index
    %7 = vector.load %arg17[%c0_5, %c0_6, %c0_7] : memref<8x8x128xf32, #tpu.memory_space<vmem>>, vector<8x8x128xf32>
    tpu.vector_store %arg17[%c0_5, %c0_6, %c0_7], %6 {strides = array<i32>} : memref<8x8x128xf32, #tpu.memory_space<vmem>>, vector<8x8x128xf32>,
    %cst_8 = arith.constant 0.000000e+00 : f32
    %8 = vector.broadcast %cst_8 : f32 to vector<8x8x32xf32>
    %c8 = arith.constant 8 : index
    %c0_9 = arith.constant 0 : index
    %c0_10 = arith.constant 0 : index
    %9 = vector.load %arg18[%c8, %c0_9, %c0_10] : memref<16x8x32xf32, #tpu.memory_space<vmem>>, vector<8x8x32xf32>
    tpu.vector_store %arg18[%c8, %c0_9, %c0_10], %8 {strides = array<i32>} : memref<16x8x32xf32, #tpu.memory_space<vmem>>, vector<8x8x32xf32>,
    %c0_11 = arith.constant 0 : index
    %c0_12 = arith.constant 0 : index
    %10 = vector.load %arg4[%c0_11, %c0_12] : memref<32x128xf32, #tpu.memory_space<vmem>>, vector<32x128xf32>
    %c0_13 = arith.constant 0 : index
    %c0_14 = arith.constant 0 : index
    %11 = vector.load %arg6[%c0_13, %c0_14] : memref<32x128xf32, #tpu.memory_space<vmem>>, vector<32x128xf32>
    %c0_15 = arith.constant 0 : index
    %c0_16 = arith.constant 0 : index
    %12 = vector.load %arg7[%c0_15, %c0_16] : memref<32x128xf32, #tpu.memory_space<vmem>>, vector<32x128xf32>
    %c0_17 = arith.constant 0 : index
    %c0_18 = arith.constant 0 : index
    %13 = vector.load %arg8[%c0_17, %c0_18] : memref<1x128xf32, #tpu.memory_space<vmem>>, vector<1x128xf32>
    %14 = vector.shape_cast %13 : vector<1x128xf32> to vector<1x128xf32>
    %15 = vector.broadcast %14 : vector<1x128xf32> to vector<8x128xf32>
    %cst_19 = arith.constant 0.000000e+00 : f32
    %16 = vector.broadcast %cst_19 : f32 to vector<8x32xf32>
    %cst_20 = arith.constant 0.000000e+00 : f32
    %17 = vector.broadcast %cst_20 : f32 to vector<8x32xf32>
    %cst_21 = arith.constant 0.000000e+00 : f32
    %18 = vector.broadcast %cst_21 : f32 to vector<8x128xf32>
    %cst_22 = arith.constant 0.000000e+00 : f32
    %19 = vector.broadcast %cst_22 : f32 to vector<8x128xf32>
    %c0_i32 = arith.constant 0 : i32
    %20 = arith.index_cast %c0_i32 : i32 to index
    %c0_23 = arith.constant 0 : index
    %c0_24 = arith.constant 0 : index
    %21 = vector.load %arg17[%20, %c0_23, %c0_24] : memref<8x8x128xf32, #tpu.memory_space<vmem>>, vector<1x8x128xf32>
    %22 = vector.shape_cast %21 : vector<1x8x128xf32> to vector<8x128xf32>
    %23 = arith.addf %22, %18 : vector<8x128xf32>
    %24 = arith.negf %23 : vector<8x128xf32>
    %25 = math.exp %24 : vector<8x128xf32>
    %cst_25 = arith.constant 1.000000e+00 : f32
    %26 = vector.broadcast %cst_25 : f32 to vector<8x128xf32>
    %27 = arith.addf %26, %25 : vector<8x128xf32>
    %28 = arith.divf %26, %27 : vector<8x128xf32>
    %29 = math.tanh %23 : vector<8x128xf32>
    %30 = vector.extract_strided_slice %28 {offsets = [0, 0], sizes = [8, 32], strides = [1, 1]} : vector<8x128xf32> to vector<8x32xf32>
    %31 = vector.extract_strided_slice %28 {offsets = [0, 32], sizes = [8, 32], strides = [1, 1]} : vector<8x128xf32> to vector<8x32xf32>
    %32 = vector.extract_strided_slice %28 {offsets = [0, 96], sizes = [8, 32], strides = [1, 1]} : vector<8x128xf32> to vector<8x32xf32>
    %33 = vector.extract_strided_slice %29 {offsets = [0, 64], sizes = [8, 32], strides = [1, 1]} : vector<8x128xf32> to vector<8x32xf32>
    %34 = arith.mulf %31, %16 : vector<8x32xf32>
    %35 = arith.mulf %30, %33 : vector<8x32xf32>
    %36 = arith.addf %34, %35 : vector<8x32xf32>
    %37 = math.tanh %36 : vector<8x32xf32>
    %38 = arith.mulf %32, %37 : vector<8x32xf32>
    %cst_26 = arith.constant dense<0.000000e+00> : vector<8x128xf32>
    %39 = tpu.matmul %38, %10, %cst_26 {dimension_numbers = #tpu.dot_dimension_numbers<[1], [0], [0], [1], [0, 0, 1, 1], [], []>} : vector<8x32xf32>, vector<32x128xf32>, vector<8x128xf32> -> vector<8x128xf32>
    %cst_27 = arith.constant dense<0.000000e+00> : vector<8x128xf32>
    %40 = tpu.matmul %38, %11, %cst_27 {dimension_numbers = #tpu.dot_dimension_numbers<[1], [0], [0], [1], [0, 0, 1, 1], [], []>} : vector<8x32xf32>, vector<32x128xf32>, vector<8x128xf32> -> vector<8x128xf32>
    %41 = arith.addf %40, %19 : vector<8x128xf32>
    %42 = arith.addf %41, %15 : vector<8x128xf32>
    %43 = arith.negf %42 : vector<8x128xf32>
    %44 = math.exp %43 : vector<8x128xf32>
    %cst_28 = arith.constant 1.000000e+00 : f32
    %45 = vector.broadcast %cst_28 : f32 to vector<8x128xf32>
    %46 = arith.addf %45, %44 : vector<8x128xf32>
    %47 = arith.divf %45, %46 : vector<8x128xf32>
    %48 = math.tanh %42 : vector<8x128xf32>
    %49 = vector.extract_strided_slice %47 {offsets = [0, 0], sizes = [8, 32], strides = [1, 1]} : vector<8x128xf32> to vector<8x32xf32>
    %50 = vector.extract_strided_slice %47 {offsets = [0, 32], sizes = [8, 32], strides = [1, 1]} : vector<8x128xf32> to vector<8x32xf32>
    %51 = vector.extract_strided_slice %47 {offsets = [0, 96], sizes = [8, 32], strides = [1, 1]} : vector<8x128xf32> to vector<8x32xf32>
    %52 = vector.extract_strided_slice %48 {offsets = [0, 64], sizes = [8, 32], strides = [1, 1]} : vector<8x128xf32> to vector<8x32xf32>
    %53 = arith.mulf %50, %17 : vector<8x32xf32>
    %54 = arith.mulf %49, %52 : vector<8x32xf32>
    %55 = arith.addf %53, %54 : vector<8x32xf32>
    %56 = math.tanh %55 : vector<8x32xf32>
    %57 = arith.mulf %51, %56 : vector<8x32xf32>
    %cst_29 = arith.constant dense<0.000000e+00> : vector<8x128xf32>
    %58 = tpu.matmul %57, %12, %cst_29 {dimension_numbers = #tpu.dot_dimension_numbers<[1], [0], [0], [1], [0, 0, 1, 1], [], []>} : vector<8x32xf32>, vector<32x128xf32>, vector<8x128xf32> -> vector<8x128xf32>
    %59 = arith.index_cast %c0_i32 : i32 to index
    %c0_30 = arith.constant 0 : index
    %c0_31 = arith.constant 0 : index
    %60 = vector.load %arg18[%59, %c0_30, %c0_31] : memref<16x8x32xf32, #tpu.memory_space<vmem>>, vector<1x8x32xf32>
    %61 = vector.shape_cast %60 : vector<1x8x32xf32> to vector<8x32xf32>
    %62 = vector.shape_cast %57 : vector<8x32xf32> to vector<1x8x32xf32>
    tpu.vector_store %arg18[%59, %c0_30, %c0_31], %62 {strides = array<i32>} : memref<16x8x32xf32, #tpu.memory_space<vmem>>, vector<1x8x32xf32>,
    %c1_i32 = arith.constant 1 : i32
    %63 = arith.index_cast %c1_i32 : i32 to index
    %c0_32 = arith.constant 0 : index
    %c0_33 = arith.constant 0 : index
    %64 = vector.load %arg17[%63, %c0_32, %c0_33] : memref<8x8x128xf32, #tpu.memory_space<vmem>>, vector<1x8x128xf32>
    %65 = vector.shape_cast %64 : vector<1x8x128xf32> to vector<8x128xf32>
    %66 = arith.addf %65, %39 : vector<8x128xf32>
    %67 = arith.negf %66 : vector<8x128xf32>
    %68 = math.exp %67 : vector<8x128xf32>
    %cst_34 = arith.constant 1.000000e+00 : f32
    %69 = vector.broadcast %cst_34 : f32 to vector<8x128xf32>
    %70 = arith.addf %69, %68 : vector<8x128xf32>
    %71 = arith.divf %69, %70 : vector<8x128xf32>
    %72 = math.tanh %66 : vector<8x128xf32>
    %73 = vector.extract_strided_slice %71 {offsets = [0, 0], sizes = [8, 32], strides = [1, 1]} : vector<8x128xf32> to vector<8x32xf32>
    %74 = vector.extract_strided_slice %71 {offsets = [0, 32], sizes = [8, 32], strides = [1, 1]} : vector<8x128xf32> to vector<8x32xf32>
    %75 = vector.extract_strided_slice %71 {offsets = [0, 96], sizes = [8, 32], strides = [1, 1]} : vector<8x128xf32> to vector<8x32xf32>
    %76 = vector.extract_strided_slice %72 {offsets = [0, 64], sizes = [8, 32], strides = [1, 1]} : vector<8x128xf32> to vector<8x32xf32>
    %77 = arith.mulf %74, %36 : vector<8x32xf32>
    %78 = arith.mulf %73, %76 : vector<8x32xf32>
    %79 = arith.addf %77, %78 : vector<8x32xf32>
    %80 = math.tanh %79 : vector<8x32xf32>
    %81 = arith.mulf %75, %80 : vector<8x32xf32>
    %cst_35 = arith.constant dense<0.000000e+00> : vector<8x128xf32>
    %82 = tpu.matmul %81, %10, %cst_35 {dimension_numbers = #tpu.dot_dimension_numbers<[1], [0], [0], [1], [0, 0, 1, 1], [], []>} : vector<8x32xf32>, vector<32x128xf32>, vector<8x128xf32> -> vector<8x128xf32>
    %cst_36 = arith.constant dense<0.000000e+00> : vector<8x128xf32>
    %83 = tpu.matmul %81, %11, %cst_36 {dimension_numbers = #tpu.dot_dimension_numbers<[1], [0], [0], [1], [0, 0, 1, 1], [], []>} : vector<8x32xf32>, vector<32x128xf32>, vector<8x128xf32> -> vector<8x128xf32>
    %84 = arith.addf %83, %58 : vector<8x128xf32>
    %85 = arith.addf %84, %15 : vector<8x128xf32>
    %86 = arith.negf %85 : vector<8x128xf32>
    %87 = math.exp %86 : vector<8x128xf32>
    %cst_37 = arith.constant 1.000000e+00 : f32
    %88 = vector.broadcast %cst_37 : f32 to vector<8x128xf32>
    %89 = arith.addf %88, %87 : vector<8x128xf32>
    %90 = arith.divf %88, %89 : vector<8x128xf32>
    %91 = math.tanh %85 : vector<8x128xf32>
    %92 = vector.extract_strided_slice %90 {offsets = [0, 0], sizes = [8, 32], strides = [1, 1]} : vector<8x128xf32> to vector<8x32xf32>
    %93 = vector.extract_strided_slice %90 {offsets = [0, 32], sizes = [8, 32], strides = [1, 1]} : vector<8x128xf32> to vector<8x32xf32>
    %94 = vector.extract_strided_slice %90 {offsets = [0, 96], sizes = [8, 32], strides = [1, 1]} : vector<8x128xf32> to vector<8x32xf32>
    %95 = vector.extract_strided_slice %91 {offsets = [0, 64], sizes = [8, 32], strides = [1, 1]} : vector<8x128xf32> to vector<8x32xf32>
    %96 = arith.mulf %93, %55 : vector<8x32xf32>
    %97 = arith.mulf %92, %95 : vector<8x32xf32>
    %98 = arith.addf %96, %97 : vector<8x32xf32>
    %99 = math.tanh %98 : vector<8x32xf32>
    %100 = arith.mulf %94, %99 : vector<8x32xf32>
    %cst_38 = arith.constant dense<0.000000e+00> : vector<8x128xf32>
    %101 = tpu.matmul %100, %12, %cst_38 {dimension_numbers = #tpu.dot_dimension_numbers<[1], [0], [0], [1], [0, 0, 1, 1], [], []>} : vector<8x32xf32>, vector<32x128xf32>, vector<8x128xf32> -> vector<8x128xf32>
    %102 = arith.index_cast %c1_i32 : i32 to index
    %c0_39 = arith.constant 0 : index
    %c0_40 = arith.constant 0 : index
    %103 = vector.load %arg18[%102, %c0_39, %c0_40] : memref<16x8x32xf32, #tpu.memory_space<vmem>>, vector<1x8x32xf32>
    %104 = vector.shape_cast %103 : vector<1x8x32xf32> to vector<8x32xf32>
    %105 = vector.shape_cast %100 : vector<8x32xf32> to vector<1x8x32xf32>
    tpu.vector_store %arg18[%102, %c0_39, %c0_40], %105 {strides = array<i32>} : memref<16x8x32xf32, #tpu.memory_space<vmem>>, vector<1x8x32xf32>,
    %c2_i32 = arith.constant 2 : i32
    %106 = arith.index_cast %c2_i32 : i32 to index
    %c0_41 = arith.constant 0 : index
    %c0_42 = arith.constant 0 : index
    %107 = vector.load %arg17[%106, %c0_41, %c0_42] : memref<8x8x128xf32, #tpu.memory_space<vmem>>, vector<1x8x128xf32>
    %108 = vector.shape_cast %107 : vector<1x8x128xf32> to vector<8x128xf32>
    %109 = arith.addf %108, %82 : vector<8x128xf32>
    %110 = arith.negf %109 : vector<8x128xf32>
    %111 = math.exp %110 : vector<8x128xf32>
    %cst_43 = arith.constant 1.000000e+00 : f32
    %112 = vector.broadcast %cst_43 : f32 to vector<8x128xf32>
    %113 = arith.addf %112, %111 : vector<8x128xf32>
    %114 = arith.divf %112, %113 : vector<8x128xf32>
    %115 = math.tanh %109 : vector<8x128xf32>
    %116 = vector.extract_strided_slice %114 {offsets = [0, 0], sizes = [8, 32], strides = [1, 1]} : vector<8x128xf32> to vector<8x32xf32>
    %117 = vector.extract_strided_slice %114 {offsets = [0, 32], sizes = [8, 32], strides = [1, 1]} : vector<8x128xf32> to vector<8x32xf32>
    %118 = vector.extract_strided_slice %114 {offsets = [0, 96], sizes = [8, 32], strides = [1, 1]} : vector<8x128xf32> to vector<8x32xf32>
    %119 = vector.extract_strided_slice %115 {offsets = [0, 64], sizes = [8, 32], strides = [1, 1]} : vector<8x128xf32> to vector<8x32xf32>
    %120 = arith.mulf %117, %79 : vector<8x32xf32>
    %121 = arith.mulf %116, %119 : vector<8x32xf32>
    %122 = arith.addf %120, %121 : vector<8x32xf32>
    %123 = math.tanh %122 : vector<8x32xf32>
    %124 = arith.mulf %118, %123 : vector<8x32xf32>
    %cst_44 = arith.constant dense<0.000000e+00> : vector<8x128xf32>
    %125 = tpu.matmul %124, %10, %cst_44 {dimension_numbers = #tpu.dot_dimension_numbers<[1], [0], [0], [1], [0, 0, 1, 1], [], []>} : vector<8x32xf32>, vector<32x128xf32>, vector<8x128xf32> -> vector<8x128xf32>
    %cst_45 = arith.constant dense<0.000000e+00> : vector<8x128xf32>
    %126 = tpu.matmul %124, %11, %cst_45 {dimension_numbers = #tpu.dot_dimension_numbers<[1], [0], [0], [1], [0, 0, 1, 1], [], []>} : vector<8x32xf32>, vector<32x128xf32>, vector<8x128xf32> -> vector<8x128xf32>
    %127 = arith.addf %126, %101 : vector<8x128xf32>
    %128 = arith.addf %127, %15 : vector<8x128xf32>
    %129 = arith.negf %128 : vector<8x128xf32>
    %130 = math.exp %129 : vector<8x128xf32>
    %cst_46 = arith.constant 1.000000e+00 : f32
    %131 = vector.broadcast %cst_46 : f32 to vector<8x128xf32>
    %132 = arith.addf %131, %130 : vector<8x128xf32>
    %133 = arith.divf %131, %132 : vector<8x128xf32>
    %134 = math.tanh %128 : vector<8x128xf32>
    %135 = vector.extract_strided_slice %133 {offsets = [0, 0], sizes = [8, 32], strides = [1, 1]} : vector<8x128xf32> to vector<8x32xf32>
    %136 = vector.extract_strided_slice %133 {offsets = [0, 32], sizes = [8, 32], strides = [1, 1]} : vector<8x128xf32> to vector<8x32xf32>
    %137 = vector.extract_strided_slice %133 {offsets = [0, 96], sizes = [8, 32], strides = [1, 1]} : vector<8x128xf32> to vector<8x32xf32>
    %138 = vector.extract_strided_slice %134 {offsets = [0, 64], sizes = [8, 32], strides = [1, 1]} : vector<8x128xf32> to vector<8x32xf32>
    %139 = arith.mulf %136, %98 : vector<8x32xf32>
    %140 = arith.mulf %135, %138 : vector<8x32xf32>
    %141 = arith.addf %139, %140 : vector<8x32xf32>
    %142 = math.tanh %141 : vector<8x32xf32>
    %143 = arith.mulf %137, %142 : vector<8x32xf32>
    %cst_47 = arith.constant dense<0.000000e+00> : vector<8x128xf32>
    %144 = tpu.matmul %143, %12, %cst_47 {dimension_numbers = #tpu.dot_dimension_numbers<[1], [0], [0], [1], [0, 0, 1, 1], [], []>} : vector<8x32xf32>, vector<32x128xf32>, vector<8x128xf32> -> vector<8x128xf32>
    %145 = arith.index_cast %c2_i32 : i32 to index
    %c0_48 = arith.constant 0 : index
    %c0_49 = arith.constant 0 : index
    %146 = vector.load %arg18[%145, %c0_48, %c0_49] : memref<16x8x32xf32, #tpu.memory_space<vmem>>, vector<1x8x32xf32>
    %147 = vector.shape_cast %146 : vector<1x8x32xf32> to vector<8x32xf32>
    %148 = vector.shape_cast %143 : vector<8x32xf32> to vector<1x8x32xf32>
    tpu.vector_store %arg18[%145, %c0_48, %c0_49], %148 {strides = array<i32>} : memref<16x8x32xf32, #tpu.memory_space<vmem>>, vector<1x8x32xf32>,
    %c3_i32 = arith.constant 3 : i32
    %149 = arith.index_cast %c3_i32 : i32 to index
    %c0_50 = arith.constant 0 : index
    %c0_51 = arith.constant 0 : index
    %150 = vector.load %arg17[%149, %c0_50, %c0_51] : memref<8x8x128xf32, #tpu.memory_space<vmem>>, vector<1x8x128xf32>
    %151 = vector.shape_cast %150 : vector<1x8x128xf32> to vector<8x128xf32>
    %152 = arith.addf %151, %125 : vector<8x128xf32>
    %153 = arith.negf %152 : vector<8x128xf32>
    %154 = math.exp %153 : vector<8x128xf32>
    %cst_52 = arith.constant 1.000000e+00 : f32
    %155 = vector.broadcast %cst_52 : f32 to vector<8x128xf32>
    %156 = arith.addf %155, %154 : vector<8x128xf32>
    %157 = arith.divf %155, %156 : vector<8x128xf32>
    %158 = math.tanh %152 : vector<8x128xf32>
    %159 = vector.extract_strided_slice %157 {offsets = [0, 0], sizes = [8, 32], strides = [1, 1]} : vector<8x128xf32> to vector<8x32xf32>
    %160 = vector.extract_strided_slice %157 {offsets = [0, 32], sizes = [8, 32], strides = [1, 1]} : vector<8x128xf32> to vector<8x32xf32>
    %161 = vector.extract_strided_slice %157 {offsets = [0, 96], sizes = [8, 32], strides = [1, 1]} : vector<8x128xf32> to vector<8x32xf32>
    %162 = vector.extract_strided_slice %158 {offsets = [0, 64], sizes = [8, 32], strides = [1, 1]} : vector<8x128xf32> to vector<8x32xf32>
    %163 = arith.mulf %160, %122 : vector<8x32xf32>
    %164 = arith.mulf %159, %162 : vector<8x32xf32>
    %165 = arith.addf %163, %164 : vector<8x32xf32>
    %166 = math.tanh %165 : vector<8x32xf32>
    %167 = arith.mulf %161, %166 : vector<8x32xf32>
    %cst_53 = arith.constant dense<0.000000e+00> : vector<8x128xf32>
    %168 = tpu.matmul %167, %10, %cst_53 {dimension_numbers = #tpu.dot_dimension_numbers<[1], [0], [0], [1], [0, 0, 1, 1], [], []>} : vector<8x32xf32>, vector<32x128xf32>, vector<8x128xf32> -> vector<8x128xf32>
    %cst_54 = arith.constant dense<0.000000e+00> : vector<8x128xf32>
    %169 = tpu.matmul %167, %11, %cst_54 {dimension_numbers = #tpu.dot_dimension_numbers<[1], [0], [0], [1], [0, 0, 1, 1], [], []>} : vector<8x32xf32>, vector<32x128xf32>, vector<8x128xf32> -> vector<8x128xf32>
    %170 = arith.addf %169, %144 : vector<8x128xf32>
    %171 = arith.addf %170, %15 : vector<8x128xf32>
    %172 = arith.negf %171 : vector<8x128xf32>
    %173 = math.exp %172 : vector<8x128xf32>
    %cst_55 = arith.constant 1.000000e+00 : f32
    %174 = vector.broadcast %cst_55 : f32 to vector<8x128xf32>
    %175 = arith.addf %174, %173 : vector<8x128xf32>
    %176 = arith.divf %174, %175 : vector<8x128xf32>
    %177 = math.tanh %171 : vector<8x128xf32>
    %178 = vector.extract_strided_slice %176 {offsets = [0, 0], sizes = [8, 32], strides = [1, 1]} : vector<8x128xf32> to vector<8x32xf32>
    %179 = vector.extract_strided_slice %176 {offsets = [0, 32], sizes = [8, 32], strides = [1, 1]} : vector<8x128xf32> to vector<8x32xf32>
    %180 = vector.extract_strided_slice %176 {offsets = [0, 96], sizes = [8, 32], strides = [1, 1]} : vector<8x128xf32> to vector<8x32xf32>
    %181 = vector.extract_strided_slice %177 {offsets = [0, 64], sizes = [8, 32], strides = [1, 1]} : vector<8x128xf32> to vector<8x32xf32>
    %182 = arith.mulf %179, %141 : vector<8x32xf32>
    %183 = arith.mulf %178, %181 : vector<8x32xf32>
    %184 = arith.addf %182, %183 : vector<8x32xf32>
    %185 = math.tanh %184 : vector<8x32xf32>
    %186 = arith.mulf %180, %185 : vector<8x32xf32>
    %cst_56 = arith.constant dense<0.000000e+00> : vector<8x128xf32>
    %187 = tpu.matmul %186, %12, %cst_56 {dimension_numbers = #tpu.dot_dimension_numbers<[1], [0], [0], [1], [0, 0, 1, 1], [], []>} : vector<8x32xf32>, vector<32x128xf32>, vector<8x128xf32> -> vector<8x128xf32>
    %188 = arith.index_cast %c3_i32 : i32 to index
    %c0_57 = arith.constant 0 : index
    %c0_58 = arith.constant 0 : index
    %189 = vector.load %arg18[%188, %c0_57, %c0_58] : memref<16x8x32xf32, #tpu.memory_space<vmem>>, vector<1x8x32xf32>
    %190 = vector.shape_cast %189 : vector<1x8x32xf32> to vector<8x32xf32>
    %191 = vector.shape_cast %186 : vector<8x32xf32> to vector<1x8x32xf32>
    tpu.vector_store %arg18[%188, %c0_57, %c0_58], %191 {strides = array<i32>} : memref<16x8x32xf32, #tpu.memory_space<vmem>>, vector<1x8x32xf32>,
    %c4_i32 = arith.constant 4 : i32
    %192 = arith.index_cast %c4_i32 : i32 to index
    %c0_59 = arith.constant 0 : index
    %c0_60 = arith.constant 0 : index
    %193 = vector.load %arg17[%192, %c0_59, %c0_60] : memref<8x8x128xf32, #tpu.memory_space<vmem>>, vector<1x8x128xf32>
    %194 = vector.shape_cast %193 : vector<1x8x128xf32> to vector<8x128xf32>
    %195 = arith.addf %194, %168 : vector<8x128xf32>
    %196 = arith.negf %195 : vector<8x128xf32>
    %197 = math.exp %196 : vector<8x128xf32>
    %cst_61 = arith.constant 1.000000e+00 : f32
    %198 = vector.broadcast %cst_61 : f32 to vector<8x128xf32>
    %199 = arith.addf %198, %197 : vector<8x128xf32>
    %200 = arith.divf %198, %199 : vector<8x128xf32>
    %201 = math.tanh %195 : vector<8x128xf32>
    %202 = vector.extract_strided_slice %200 {offsets = [0, 0], sizes = [8, 32], strides = [1, 1]} : vector<8x128xf32> to vector<8x32xf32>
    %203 = vector.extract_strided_slice %200 {offsets = [0, 32], sizes = [8, 32], strides = [1, 1]} : vector<8x128xf32> to vector<8x32xf32>
    %204 = vector.extract_strided_slice %200 {offsets = [0, 96], sizes = [8, 32], strides = [1, 1]} : vector<8x128xf32> to vector<8x32xf32>
    %205 = vector.extract_strided_slice %201 {offsets = [0, 64], sizes = [8, 32], strides = [1, 1]} : vector<8x128xf32> to vector<8x32xf32>
    %206 = arith.mulf %203, %165 : vector<8x32xf32>
    %207 = arith.mulf %202, %205 : vector<8x32xf32>
    %208 = arith.addf %206, %207 : vector<8x32xf32>
    %209 = math.tanh %208 : vector<8x32xf32>
    %210 = arith.mulf %204, %209 : vector<8x32xf32>
    %cst_62 = arith.constant dense<0.000000e+00> : vector<8x128xf32>
    %211 = tpu.matmul %210, %10, %cst_62 {dimension_numbers = #tpu.dot_dimension_numbers<[1], [0], [0], [1], [0, 0, 1, 1], [], []>} : vector<8x32xf32>, vector<32x128xf32>, vector<8x128xf32> -> vector<8x128xf32>
    %cst_63 = arith.constant dense<0.000000e+00> : vector<8x128xf32>
    %212 = tpu.matmul %210, %11, %cst_63 {dimension_numbers = #tpu.dot_dimension_numbers<[1], [0], [0], [1], [0, 0, 1, 1], [], []>} : vector<8x32xf32>, vector<32x128xf32>, vector<8x128xf32> -> vector<8x128xf32>
    %213 = arith.addf %212, %187 : vector<8x128xf32>
    %214 = arith.addf %213, %15 : vector<8x128xf32>
    %215 = arith.negf %214 : vector<8x128xf32>
    %216 = math.exp %215 : vector<8x128xf32>
    %cst_64 = arith.constant 1.000000e+00 : f32
    %217 = vector.broadcast %cst_64 : f32 to vector<8x128xf32>
    %218 = arith.addf %217, %216 : vector<8x128xf32>
    %219 = arith.divf %217, %218 : vector<8x128xf32>
    %220 = math.tanh %214 : vector<8x128xf32>
    %221 = vector.extract_strided_slice %219 {offsets = [0, 0], sizes = [8, 32], strides = [1, 1]} : vector<8x128xf32> to vector<8x32xf32>
    %222 = vector.extract_strided_slice %219 {offsets = [0, 32], sizes = [8, 32], strides = [1, 1]} : vector<8x128xf32> to vector<8x32xf32>
    %223 = vector.extract_strided_slice %219 {offsets = [0, 96], sizes = [8, 32], strides = [1, 1]} : vector<8x128xf32> to vector<8x32xf32>
    %224 = vector.extract_strided_slice %220 {offsets = [0, 64], sizes = [8, 32], strides = [1, 1]} : vector<8x128xf32> to vector<8x32xf32>
    %225 = arith.mulf %222, %184 : vector<8x32xf32>
    %226 = arith.mulf %221, %224 : vector<8x32xf32>
    %227 = arith.addf %225, %226 : vector<8x32xf32>
    %228 = math.tanh %227 : vector<8x32xf32>
    %229 = arith.mulf %223, %228 : vector<8x32xf32>
    %cst_65 = arith.constant dense<0.000000e+00> : vector<8x128xf32>
    %230 = tpu.matmul %229, %12, %cst_65 {dimension_numbers = #tpu.dot_dimension_numbers<[1], [0], [0], [1], [0, 0, 1, 1], [], []>} : vector<8x32xf32>, vector<32x128xf32>, vector<8x128xf32> -> vector<8x128xf32>
    %231 = arith.index_cast %c4_i32 : i32 to index
    %c0_66 = arith.constant 0 : index
    %c0_67 = arith.constant 0 : index
    %232 = vector.load %arg18[%231, %c0_66, %c0_67] : memref<16x8x32xf32, #tpu.memory_space<vmem>>, vector<1x8x32xf32>
    %233 = vector.shape_cast %232 : vector<1x8x32xf32> to vector<8x32xf32>
    %234 = vector.shape_cast %229 : vector<8x32xf32> to vector<1x8x32xf32>
    tpu.vector_store %arg18[%231, %c0_66, %c0_67], %234 {strides = array<i32>} : memref<16x8x32xf32, #tpu.memory_space<vmem>>, vector<1x8x32xf32>,
    %c5_i32 = arith.constant 5 : i32
    %235 = arith.index_cast %c5_i32 : i32 to index
    %c0_68 = arith.constant 0 : index
    %c0_69 = arith.constant 0 : index
    %236 = vector.load %arg17[%235, %c0_68, %c0_69] : memref<8x8x128xf32, #tpu.memory_space<vmem>>, vector<1x8x128xf32>
    %237 = vector.shape_cast %236 : vector<1x8x128xf32> to vector<8x128xf32>
    %238 = arith.addf %237, %211 : vector<8x128xf32>
    %239 = arith.negf %238 : vector<8x128xf32>
    %240 = math.exp %239 : vector<8x128xf32>
    %cst_70 = arith.constant 1.000000e+00 : f32
    %241 = vector.broadcast %cst_70 : f32 to vector<8x128xf32>
    %242 = arith.addf %241, %240 : vector<8x128xf32>
    %243 = arith.divf %241, %242 : vector<8x128xf32>
    %244 = math.tanh %238 : vector<8x128xf32>
    %245 = vector.extract_strided_slice %243 {offsets = [0, 0], sizes = [8, 32], strides = [1, 1]} : vector<8x128xf32> to vector<8x32xf32>
    %246 = vector.extract_strided_slice %243 {offsets = [0, 32], sizes = [8, 32], strides = [1, 1]} : vector<8x128xf32> to vector<8x32xf32>
    %247 = vector.extract_strided_slice %243 {offsets = [0, 96], sizes = [8, 32], strides = [1, 1]} : vector<8x128xf32> to vector<8x32xf32>
    %248 = vector.extract_strided_slice %244 {offsets = [0, 64], sizes = [8, 32], strides = [1, 1]} : vector<8x128xf32> to vector<8x32xf32>
    %249 = arith.mulf %246, %208 : vector<8x32xf32>
    %250 = arith.mulf %245, %248 : vector<8x32xf32>
    %251 = arith.addf %249, %250 : vector<8x32xf32>
    %252 = math.tanh %251 : vector<8x32xf32>
    %253 = arith.mulf %247, %252 : vector<8x32xf32>
    %cst_71 = arith.constant dense<0.000000e+00> : vector<8x128xf32>
    %254 = tpu.matmul %253, %10, %cst_71 {dimension_numbers = #tpu.dot_dimension_numbers<[1], [0], [0], [1], [0, 0, 1, 1], [], []>} : vector<8x32xf32>, vector<32x128xf32>, vector<8x128xf32> -> vector<8x128xf32>
    %cst_72 = arith.constant dense<0.000000e+00> : vector<8x128xf32>
    %255 = tpu.matmul %253, %11, %cst_72 {dimension_numbers = #tpu.dot_dimension_numbers<[1], [0], [0], [1], [0, 0, 1, 1], [], []>} : vector<8x32xf32>, vector<32x128xf32>, vector<8x128xf32> -> vector<8x128xf32>
    %256 = arith.addf %255, %230 : vector<8x128xf32>
    %257 = arith.addf %256, %15 : vector<8x128xf32>
    %258 = arith.negf %257 : vector<8x128xf32>
    %259 = math.exp %258 : vector<8x128xf32>
    %cst_73 = arith.constant 1.000000e+00 : f32
    %260 = vector.broadcast %cst_73 : f32 to vector<8x128xf32>
    %261 = arith.addf %260, %259 : vector<8x128xf32>
    %262 = arith.divf %260, %261 : vector<8x128xf32>
    %263 = math.tanh %257 : vector<8x128xf32>
    %264 = vector.extract_strided_slice %262 {offsets = [0, 0], sizes = [8, 32], strides = [1, 1]} : vector<8x128xf32> to vector<8x32xf32>
    %265 = vector.extract_strided_slice %262 {offsets = [0, 32], sizes = [8, 32], strides = [1, 1]} : vector<8x128xf32> to vector<8x32xf32>
    %266 = vector.extract_strided_slice %262 {offsets = [0, 96], sizes = [8, 32], strides = [1, 1]} : vector<8x128xf32> to vector<8x32xf32>
    %267 = vector.extract_strided_slice %263 {offsets = [0, 64], sizes = [8, 32], strides = [1, 1]} : vector<8x128xf32> to vector<8x32xf32>
    %268 = arith.mulf %265, %227 : vector<8x32xf32>
    %269 = arith.mulf %264, %267 : vector<8x32xf32>
    %270 = arith.addf %268, %269 : vector<8x32xf32>
    %271 = math.tanh %270 : vector<8x32xf32>
    %272 = arith.mulf %266, %271 : vector<8x32xf32>
    %cst_74 = arith.constant dense<0.000000e+00> : vector<8x128xf32>
    %273 = tpu.matmul %272, %12, %cst_74 {dimension_numbers = #tpu.dot_dimension_numbers<[1], [0], [0], [1], [0, 0, 1, 1], [], []>} : vector<8x32xf32>, vector<32x128xf32>, vector<8x128xf32> -> vector<8x128xf32>
    %274 = arith.index_cast %c5_i32 : i32 to index
    %c0_75 = arith.constant 0 : index
    %c0_76 = arith.constant 0 : index
    %275 = vector.load %arg18[%274, %c0_75, %c0_76] : memref<16x8x32xf32, #tpu.memory_space<vmem>>, vector<1x8x32xf32>
    %276 = vector.shape_cast %275 : vector<1x8x32xf32> to vector<8x32xf32>
    %277 = vector.shape_cast %272 : vector<8x32xf32> to vector<1x8x32xf32>
    tpu.vector_store %arg18[%274, %c0_75, %c0_76], %277 {strides = array<i32>} : memref<16x8x32xf32, #tpu.memory_space<vmem>>, vector<1x8x32xf32>,
    %c6_i32 = arith.constant 6 : i32
    %278 = arith.index_cast %c6_i32 : i32 to index
    %c0_77 = arith.constant 0 : index
    %c0_78 = arith.constant 0 : index
    %279 = vector.load %arg17[%278, %c0_77, %c0_78] : memref<8x8x128xf32, #tpu.memory_space<vmem>>, vector<1x8x128xf32>
    %280 = vector.shape_cast %279 : vector<1x8x128xf32> to vector<8x128xf32>
    %281 = arith.addf %280, %254 : vector<8x128xf32>
    %282 = arith.negf %281 : vector<8x128xf32>
    %283 = math.exp %282 : vector<8x128xf32>
    %cst_79 = arith.constant 1.000000e+00 : f32
    %284 = vector.broadcast %cst_79 : f32 to vector<8x128xf32>
    %285 = arith.addf %284, %283 : vector<8x128xf32>
    %286 = arith.divf %284, %285 : vector<8x128xf32>
    %287 = math.tanh %281 : vector<8x128xf32>
    %288 = vector.extract_strided_slice %286 {offsets = [0, 0], sizes = [8, 32], strides = [1, 1]} : vector<8x128xf32> to vector<8x32xf32>
    %289 = vector.extract_strided_slice %286 {offsets = [0, 32], sizes = [8, 32], strides = [1, 1]} : vector<8x128xf32> to vector<8x32xf32>
    %290 = vector.extract_strided_slice %286 {offsets = [0, 96], sizes = [8, 32], strides = [1, 1]} : vector<8x128xf32> to vector<8x32xf32>
    %291 = vector.extract_strided_slice %287 {offsets = [0, 64], sizes = [8, 32], strides = [1, 1]} : vector<8x128xf32> to vector<8x32xf32>
    %292 = arith.mulf %289, %251 : vector<8x32xf32>
    %293 = arith.mulf %288, %291 : vector<8x32xf32>
    %294 = arith.addf %292, %293 : vector<8x32xf32>
    %295 = math.tanh %294 : vector<8x32xf32>
    %296 = arith.mulf %290, %295 : vector<8x32xf32>
    %cst_80 = arith.constant dense<0.000000e+00> : vector<8x128xf32>
    %297 = tpu.matmul %296, %10, %cst_80 {dimension_numbers = #tpu.dot_dimension_numbers<[1], [0], [0], [1], [0, 0, 1, 1], [], []>} : vector<8x32xf32>, vector<32x128xf32>, vector<8x128xf32> -> vector<8x128xf32>
    %cst_81 = arith.constant dense<0.000000e+00> : vector<8x128xf32>
    %298 = tpu.matmul %296, %11, %cst_81 {dimension_numbers = #tpu.dot_dimension_numbers<[1], [0], [0], [1], [0, 0, 1, 1], [], []>} : vector<8x32xf32>, vector<32x128xf32>, vector<8x128xf32> -> vector<8x128xf32>
    %299 = arith.addf %298, %273 : vector<8x128xf32>
    %300 = arith.addf %299, %15 : vector<8x128xf32>
    %301 = arith.negf %300 : vector<8x128xf32>
    %302 = math.exp %301 : vector<8x128xf32>
    %cst_82 = arith.constant 1.000000e+00 : f32
    %303 = vector.broadcast %cst_82 : f32 to vector<8x128xf32>
    %304 = arith.addf %303, %302 : vector<8x128xf32>
    %305 = arith.divf %303, %304 : vector<8x128xf32>
    %306 = math.tanh %300 : vector<8x128xf32>
    %307 = vector.extract_strided_slice %305 {offsets = [0, 0], sizes = [8, 32], strides = [1, 1]} : vector<8x128xf32> to vector<8x32xf32>
    %308 = vector.extract_strided_slice %305 {offsets = [0, 32], sizes = [8, 32], strides = [1, 1]} : vector<8x128xf32> to vector<8x32xf32>
    %309 = vector.extract_strided_slice %305 {offsets = [0, 96], sizes = [8, 32], strides = [1, 1]} : vector<8x128xf32> to vector<8x32xf32>
    %310 = vector.extract_strided_slice %306 {offsets = [0, 64], sizes = [8, 32], strides = [1, 1]} : vector<8x128xf32> to vector<8x32xf32>
    %311 = arith.mulf %308, %270 : vector<8x32xf32>
    %312 = arith.mulf %307, %310 : vector<8x32xf32>
    %313 = arith.addf %311, %312 : vector<8x32xf32>
    %314 = math.tanh %313 : vector<8x32xf32>
    %315 = arith.mulf %309, %314 : vector<8x32xf32>
    %cst_83 = arith.constant dense<0.000000e+00> : vector<8x128xf32>
    %316 = tpu.matmul %315, %12, %cst_83 {dimension_numbers = #tpu.dot_dimension_numbers<[1], [0], [0], [1], [0, 0, 1, 1], [], []>} : vector<8x32xf32>, vector<32x128xf32>, vector<8x128xf32> -> vector<8x128xf32>
    %317 = arith.index_cast %c6_i32 : i32 to index
    %c0_84 = arith.constant 0 : index
    %c0_85 = arith.constant 0 : index
    %318 = vector.load %arg18[%317, %c0_84, %c0_85] : memref<16x8x32xf32, #tpu.memory_space<vmem>>, vector<1x8x32xf32>
    %319 = vector.shape_cast %318 : vector<1x8x32xf32> to vector<8x32xf32>
    %320 = vector.shape_cast %315 : vector<8x32xf32> to vector<1x8x32xf32>
    tpu.vector_store %arg18[%317, %c0_84, %c0_85], %320 {strides = array<i32>} : memref<16x8x32xf32, #tpu.memory_space<vmem>>, vector<1x8x32xf32>,
    %c7_i32 = arith.constant 7 : i32
    %321 = arith.index_cast %c7_i32 : i32 to index
    %c0_86 = arith.constant 0 : index
    %c0_87 = arith.constant 0 : index
    %322 = vector.load %arg17[%321, %c0_86, %c0_87] : memref<8x8x128xf32, #tpu.memory_space<vmem>>, vector<1x8x128xf32>
    %323 = vector.shape_cast %322 : vector<1x8x128xf32> to vector<8x128xf32>
    %324 = arith.addf %323, %297 : vector<8x128xf32>
    %325 = arith.negf %324 : vector<8x128xf32>
    %326 = math.exp %325 : vector<8x128xf32>
    %cst_88 = arith.constant 1.000000e+00 : f32
    %327 = vector.broadcast %cst_88 : f32 to vector<8x128xf32>
    %328 = arith.addf %327, %326 : vector<8x128xf32>
    %329 = arith.divf %327, %328 : vector<8x128xf32>
    %330 = math.tanh %324 : vector<8x128xf32>
    %331 = vector.extract_strided_slice %329 {offsets = [0, 0], sizes = [8, 32], strides = [1, 1]} : vector<8x128xf32> to vector<8x32xf32>
    %332 = vector.extract_strided_slice %329 {offsets = [0, 32], sizes = [8, 32], strides = [1, 1]} : vector<8x128xf32> to vector<8x32xf32>
    %333 = vector.extract_strided_slice %329 {offsets = [0, 96], sizes = [8, 32], strides = [1, 1]} : vector<8x128xf32> to vector<8x32xf32>
    %334 = vector.extract_strided_slice %330 {offsets = [0, 64], sizes = [8, 32], strides = [1, 1]} : vector<8x128xf32> to vector<8x32xf32>
    %335 = arith.mulf %332, %294 : vector<8x32xf32>
    %336 = arith.mulf %331, %334 : vector<8x32xf32>
    %337 = arith.addf %335, %336 : vector<8x32xf32>
    %338 = math.tanh %337 : vector<8x32xf32>
    %339 = arith.mulf %333, %338 : vector<8x32xf32>
    %cst_89 = arith.constant dense<0.000000e+00> : vector<8x128xf32>
    %340 = tpu.matmul %339, %10, %cst_89 {dimension_numbers = #tpu.dot_dimension_numbers<[1], [0], [0], [1], [0, 0, 1, 1], [], []>} : vector<8x32xf32>, vector<32x128xf32>, vector<8x128xf32> -> vector<8x128xf32>
    %cst_90 = arith.constant dense<0.000000e+00> : vector<8x128xf32>
    %341 = tpu.matmul %339, %11, %cst_90 {dimension_numbers = #tpu.dot_dimension_numbers<[1], [0], [0], [1], [0, 0, 1, 1], [], []>} : vector<8x32xf32>, vector<32x128xf32>, vector<8x128xf32> -> vector<8x128xf32>
    %342 = arith.addf %341, %316 : vector<8x128xf32>
    %343 = arith.addf %342, %15 : vector<8x128xf32>
    %344 = arith.negf %343 : vector<8x128xf32>
    %345 = math.exp %344 : vector<8x128xf32>
    %cst_91 = arith.constant 1.000000e+00 : f32
    %346 = vector.broadcast %cst_91 : f32 to vector<8x128xf32>
    %347 = arith.addf %346, %345 : vector<8x128xf32>
    %348 = arith.divf %346, %347 : vector<8x128xf32>
    %349 = math.tanh %343 : vector<8x128xf32>
    %350 = vector.extract_strided_slice %348 {offsets = [0, 0], sizes = [8, 32], strides = [1, 1]} : vector<8x128xf32> to vector<8x32xf32>
    %351 = vector.extract_strided_slice %348 {offsets = [0, 32], sizes = [8, 32], strides = [1, 1]} : vector<8x128xf32> to vector<8x32xf32>
    %352 = vector.extract_strided_slice %348 {offsets = [0, 96], sizes = [8, 32], strides = [1, 1]} : vector<8x128xf32> to vector<8x32xf32>
    %353 = vector.extract_strided_slice %349 {offsets = [0, 64], sizes = [8, 32], strides = [1, 1]} : vector<8x128xf32> to vector<8x32xf32>
    %354 = arith.mulf %351, %313 : vector<8x32xf32>
    %355 = arith.mulf %350, %353 : vector<8x32xf32>
    %356 = arith.addf %354, %355 : vector<8x32xf32>
    %357 = math.tanh %356 : vector<8x32xf32>
    %358 = arith.mulf %352, %357 : vector<8x32xf32>
    %cst_92 = arith.constant dense<0.000000e+00> : vector<8x128xf32>
    %359 = tpu.matmul %358, %12, %cst_92 {dimension_numbers = #tpu.dot_dimension_numbers<[1], [0], [0], [1], [0, 0, 1, 1], [], []>} : vector<8x32xf32>, vector<32x128xf32>, vector<8x128xf32> -> vector<8x128xf32>
    %360 = arith.index_cast %c7_i32 : i32 to index
    %c0_93 = arith.constant 0 : index
    %c0_94 = arith.constant 0 : index
    %361 = vector.load %arg18[%360, %c0_93, %c0_94] : memref<16x8x32xf32, #tpu.memory_space<vmem>>, vector<1x8x32xf32>
    %362 = vector.shape_cast %361 : vector<1x8x32xf32> to vector<8x32xf32>
    %363 = vector.shape_cast %358 : vector<8x32xf32> to vector<1x8x32xf32>
    tpu.vector_store %arg18[%360, %c0_93, %c0_94], %363 {strides = array<i32>} : memref<16x8x32xf32, #tpu.memory_space<vmem>>, vector<1x8x32xf32>,
    %c8_i32 = arith.constant 8 : i32
    %c0_95 = arith.constant 0 : index
    %c0_96 = arith.constant 0 : index
    %364 = vector.load %arg2[%c0_95, %c0_96] : memref<128x16xbf16, #tpu.memory_space<vmem>>, vector<128x16xbf16>
    %c0_97 = arith.constant 0 : index
    %c0_98 = arith.constant 0 : index
    %c0_99 = arith.constant 0 : index
    %365 = vector.load %arg18[%c0_97, %c0_98, %c0_99] : memref<16x8x32xf32, #tpu.memory_space<vmem>>, vector<16x8x32xf32>
    %366 = vector.shape_cast %365 : vector<16x8x32xf32> to vector<128x32xf32>
    %367 = arith.truncf %366 : vector<128x32xf32> to vector<128x32xbf16>
    %c0_100 = arith.constant 0 : index
    %c0_101 = arith.constant 0 : index
    %368 = vector.load %arg9[%c0_100, %c0_101] : memref<16x64xbf16, #tpu.memory_space<vmem>>, vector<16x64xbf16>
    %cst_102 = arith.constant dense<0.000000e+00> : vector<128x64xf32>
    %369 = tpu.matmul %364, %368, %cst_102 {dimension_numbers = #tpu.dot_dimension_numbers<[1], [0], [0], [1], [0, 0, 1, 1], [], []>} : vector<128x16xbf16>, vector<16x64xbf16>, vector<128x64xf32> -> vector<128x64xf32>
    %c0_103 = arith.constant 0 : index
    %c0_104 = arith.constant 0 : index
    %370 = vector.load %arg10[%c0_103, %c0_104] : memref<32x64xbf16, #tpu.memory_space<vmem>>, vector<32x64xbf16>
    %cst_105 = arith.constant dense<0.000000e+00> : vector<128x64xf32>
    %371 = tpu.matmul %367, %370, %cst_105 {dimension_numbers = #tpu.dot_dimension_numbers<[1], [0], [0], [1], [0, 0, 1, 1], [], []>} : vector<128x32xbf16>, vector<32x64xbf16>, vector<128x64xf32> -> vector<128x64xf32>
    %372 = arith.addf %369, %371 : vector<128x64xf32>
    %c0_106 = arith.constant 0 : index
    %c0_107 = arith.constant 0 : index
    %373 = vector.load %arg11[%c0_106, %c0_107] : memref<1x64xf32, #tpu.memory_space<vmem>>, vector<1x64xf32>
    %374 = vector.broadcast %373 : vector<1x64xf32> to vector<128x64xf32>
    %375 = arith.addf %372, %374 : vector<128x64xf32>
    %cst_108 = arith.constant 0.000000e+00 : f32
    %376 = vector.broadcast %cst_108 : f32 to vector<128x64xf32>
    %377 = arith.cmpf oge, %375, %376 : vector<128x64xf32>
    %cst_109 = arith.constant 0.00999999977 : f32
    %378 = vector.broadcast %cst_109 : f32 to vector<128x64xf32>
    %379 = arith.mulf %378, %375 : vector<128x64xf32>
    %380 = arith.select %377, %375, %379 : vector<128x64xi1>, vector<128x64xf32>
    %381 = arith.truncf %380 : vector<128x64xf32> to vector<128x64xbf16>
    %c0_110 = arith.constant 0 : index
    %c0_111 = arith.constant 0 : index
    %382 = vector.load %arg12[%c0_110, %c0_111] : memref<64x16xbf16, #tpu.memory_space<vmem>>, vector<64x16xbf16>
    %cst_112 = arith.constant dense<0.000000e+00> : vector<128x16xf32>
    %383 = tpu.matmul %381, %382, %cst_112 {dimension_numbers = #tpu.dot_dimension_numbers<[1], [0], [0], [1], [0, 0, 1, 1], [], []>} : vector<128x64xbf16>, vector<64x16xbf16>, vector<128x16xf32> -> vector<128x16xf32>
    %c0_113 = arith.constant 0 : index
    %c0_114 = arith.constant 0 : index
    %384 = vector.load %arg13[%c0_113, %c0_114] : memref<1x16xf32, #tpu.memory_space<vmem>>, vector<1x16xf32>
    %385 = vector.broadcast %384 : vector<1x16xf32> to vector<128x16xf32>
    %386 = arith.addf %383, %385 : vector<128x16xf32>
    %cst_115 = arith.constant 0.000000e+00 : f32
    %387 = vector.broadcast %cst_115 : f32 to vector<128x16xf32>
    %388 = arith.cmpf oge, %386, %387 : vector<128x16xf32>
    %cst_116 = arith.constant 0.00999999977 : f32
    %389 = vector.broadcast %cst_116 : f32 to vector<128x16xf32>
    %390 = arith.mulf %389, %386 : vector<128x16xf32>
    %391 = arith.select %388, %386, %390 : vector<128x16xi1>, vector<128x16xf32>
    %c0_117 = arith.constant 0 : index
    %c0_118 = arith.constant 0 : index
    %392 = vector.load %arg14[%c0_117, %c0_118] : memref<1x16xf32, #tpu.memory_space<vmem>>, vector<1x16xf32>
    %cst_119 = arith.constant dense<0.000000e+00> : vector<1x128xf32>
    %393 = tpu.matmul %392, %391, %cst_119 {dimension_numbers = #tpu.dot_dimension_numbers<[1], [1], [0], [0], [0, 0, 1, 0], [], []>} : vector<1x16xf32>, vector<128x16xf32>, vector<1x128xf32> -> vector<1x128xf32>
    %c0_120 = arith.constant 0 : index
    %c0_121 = arith.constant 0 : index
    %394 = vector.load %arg15[%c0_120, %c0_121] : memref<1x1xf32, #tpu.memory_space<vmem>>, vector<1x1xf32>
    %395 = vector.broadcast %394 : vector<1x1xf32> to vector<1x128xf32>
    %396 = arith.addf %393, %395 : vector<1x128xf32>
    %cst_122 = arith.constant 0.000000e+00 : f32
    %397 = vector.broadcast %cst_122 : f32 to vector<1x128xf32>
    %398 = arith.cmpf oge, %396, %397 : vector<1x128xf32>
    %cst_123 = arith.constant 0.00999999977 : f32
    %399 = vector.broadcast %cst_123 : f32 to vector<1x128xf32>
    %400 = arith.mulf %399, %396 : vector<1x128xf32>
    %401 = arith.select %398, %396, %400 : vector<1x128xi1>, vector<1x128xf32>
    %c0_124 = arith.constant 0 : index
    %c0_125 = arith.constant 0 : index
    %402 = vector.load %arg16[%c0_124, %c0_125] : memref<1x128xf32, #tpu.memory_space<vmem>>, vector<1x128xf32>
    tpu.vector_store %arg16[%c0_124, %c0_125], %401 {strides = array<i32>} : memref<1x128xf32, #tpu.memory_space<vmem>>, vector<1x128xf32>,
    return
  }
  func.func @transform_0(%arg0: i32) -> (i32, i32) {
    %c0_i32 = arith.constant 0 : i32
    %c0_i32_0 = arith.constant 0 : i32
    %c0_i32_1 = arith.constant 0 : i32
    return %c0_i32, %c0_i32_0 : i32, i32
  }
  func.func @transform_1(%arg0: i32) -> (i32, i32) {
    %c0_i32 = arith.constant 0 : i32
    %c0_i32_0 = arith.constant 0 : i32
    %c0_i32_1 = arith.constant 0 : i32
    return %c0_i32, %c0_i32_0 : i32, i32
  }
  func.func @transform_2(%arg0: i32) -> (i32, i32) {
    %c0_i32 = arith.constant 0 : i32
    %c0_i32_0 = arith.constant 0 : i32
    %c0_i32_1 = arith.constant 0 : i32
    return %c0_i32, %c0_i32_0 : i32, i32
  }
  func.func @transform_3(%arg0: i32) -> (i32, i32) {
    %c0_i32 = arith.constant 0 : i32
    %c0_i32_0 = arith.constant 0 : i32
    %c0_i32_1 = arith.constant 0 : i32
    return %c0_i32, %c0_i32_0 : i32, i32
  }
  func.func @transform_4(%arg0: i32) -> (i32, i32) {
    %c0_i32 = arith.constant 0 : i32
    %c0_i32_0 = arith.constant 0 : i32
    %c0_i32_1 = arith.constant 0 : i32
    return %c0_i32, %c0_i32_0 : i32, i32
  }
  func.func @transform_5(%arg0: i32) -> (i32, i32) {
    %c0_i32 = arith.constant 0 : i32
    %c0_i32_0 = arith.constant 0 : i32
    %c0_i32_1 = arith.constant 0 : i32
    return %c0_i32, %c0_i32_0 : i32, i32
  }
  func.func @transform_6(%arg0: i32) -> (i32, i32) {
    %c0_i32 = arith.constant 0 : i32
    %c0_i32_0 = arith.constant 0 : i32
    %c0_i32_1 = arith.constant 0 : i32
    return %c0_i32, %c0_i32_0 : i32, i32
  }
  func.func @transform_7(%arg0: i32) -> (i32, i32) {
    %c0_i32 = arith.constant 0 : i32
    %c0_i32_0 = arith.constant 0 : i32
    %c0_i32_1 = arith.constant 0 : i32
    return %c0_i32, %c0_i32_0 : i32, i32
  }
  func.func @transform_8(%arg0: i32) -> (i32, i32) {
    %c0_i32 = arith.constant 0 : i32
    %c0_i32_0 = arith.constant 0 : i32
    %c0_i32_1 = arith.constant 0 : i32
    return %c0_i32, %c0_i32_0 : i32, i32
  }
  func.func @transform_9(%arg0: i32) -> (i32, i32) {
    %c0_i32 = arith.constant 0 : i32
    %c0_i32_0 = arith.constant 0 : i32
    %c0_i32_1 = arith.constant 0 : i32
    return %c0_i32, %c0_i32_0 : i32, i32
  }
  func.func @transform_10(%arg0: i32) -> (i32, i32) {
    %c0_i32 = arith.constant 0 : i32
    %c0_i32_0 = arith.constant 0 : i32
    %c0_i32_1 = arith.constant 0 : i32
    return %c0_i32, %c0_i32_0 : i32, i32
  }
  func.func @transform_11(%arg0: i32) -> (i32, i32) {
    %c0_i32 = arith.constant 0 : i32
    %c0_i32_0 = arith.constant 0 : i32
    %c0_i32_1 = arith.constant 0 : i32
    return %c0_i32, %c0_i32_0 : i32, i32
  }
  func.func @transform_12(%arg0: i32) -> (i32, i32) {
    %c0_i32 = arith.constant 0 : i32
    %c0_i32_0 = arith.constant 0 : i32
    %c0_i32_1 = arith.constant 0 : i32
    return %c0_i32, %c0_i32_0 : i32, i32
  }
  func.func @transform_13(%arg0: i32) -> (i32, i32) {
    %c0_i32 = arith.constant 0 : i32
    %c0_i32_0 = arith.constant 0 : i32
    %c0_i32_1 = arith.constant 0 : i32
    return %c0_i32, %c0_i32_0 : i32, i32
  }
  func.func @transform_14(%arg0: i32) -> (i32, i32) {
    %c0_i32 = arith.constant 0 : i32
    %c0_i32_0 = arith.constant 0 : i32
    %c0_i32_1 = arith.constant 0 : i32
    return %c0_i32, %c0_i32_0 : i32, i32
  }
  func.func @transform_15(%arg0: i32) -> (i32, i32) {
    %c0_i32 = arith.constant 0 : i32
    %c0_i32_0 = arith.constant 0 : i32
    %c0_i32_1 = arith.constant 0 : i32
    return %c0_i32, %c0_i32_0 : i32, i32
  }
}

</mosaic_0001>

<bundles_post_ra>
// kernel: tpu_custom_call.1
= control target key start
LH: loop header
LB: loop body
LE: loop exit
PB: predicated region body
PF: predicated region fallthrough
CT: control target
= control target key end

     0   :  { %s2898_s0 = inlined_call_operand.vmem [shape: bf16[64,17], index: 0, kind: input, shape index: {}]   ;;  %s2899_s1 = inlined_call_operand.vmem [shape: bf16[128,16], index: 1, kind: input, shape index: {}]   ;;  %s2900_s2 = inlined_call_operand.vmem [shape: bf16[17,128], index: 2, kind: input, shape index: {}]   ;;  %s2901_s3 = inlined_call_operand.vmem [shape: f32[32,128], index: 3, kind: input, shape index: {}]   ;;  %s2902_s4 = inlined_call_operand.vmem [shape: f32[1,128], index: 4, kind: input, shape index: {}]   ;;  %s2903_s5 = inlined_call_operand.vmem [shape: f32[32,128], index: 5, kind: input, shape index: {}]   ;;  %s2904_s6 = inlined_call_operand.vmem [shape: f32[32,128], index: 6, kind: input, shape index: {}]   ;;  %s2905_s7 = inlined_call_operand.vmem [shape: f32[1,128], index: 7, kind: input, shape index: {}]   ;;  %s2906_s8 = inlined_call_operand.vmem [shape: bf16[16,64], index: 8, kind: input, shape index: {}]   ;;  %s2907_s9 = inlined_call_operand.vmem [shape: bf16[32,64], index: 9, kind: input, shape index: {}]   ;;  %s2908_s10 = inlined_call_operand.vmem [shape: f32[1,64], index: 10, kind: input, shape index: {}]   ;;  %s2909_s11 = inlined_call_operand.vmem [shape: bf16[64,16], index: 11, kind: input, shape index: {}]   ;;  %s2910_s12 = inlined_call_operand.vmem [shape: f32[1,16], index: 12, kind: input, shape index: {}]   ;;  %s2911_s13 = inlined_call_operand.vmem [shape: f32[1,16], index: 13, kind: input, shape index: {}]   ;;  %s2912_s14 = inlined_call_operand.<no memory space> [shape: f32[1,1], index: 14, kind: input, shape index: {}]   ;;  %s2913_s15 = inlined_call_operand.hbm [shape: f32[1,128], index: 15, kind: output, shape index: {}]  }
   0x1   :  { %v20_v0 = vstv %s2912_s14 }
   0x2   :  { %21 = vst [vmem:[#allocation4] sm:$0x1] %v20_v0 }
   0x3   :  { %v64_v1 = vld [vmem:[%s2900_s2 + $0x8] sm:$0x1]  ;;  %vm111_vm0 = vcmask 1040384   ;;  %v2279_v3 = vmov 0  }
   0x4   :  { %v94_v2 = vunpack.c.l.b16 %v64_v1  ;;  %v113_v4 = vsel %vm111_vm0, 65535, %v2279_v3  ;;  %2117 = vset.pattern.permute.xlu1 %v2279_v3  ;;  %2118 = vset.pattern.permute.xlu0 %v2279_v3 }
   0x6   :  { %v96_v5 = vpack.c.b16 %v94_v2, %v94_v2 }
   0x7   :  { %22 = vsyncpa [#allocation6], 0  ;;  %v2094_v7 = vld [vmem:[%s2900_s2] sm:$0xff]  ;;  %vm98_vm1 = vcmask 138240   ;;  %s2280_s2 = smov 64   ;;  %s2281_s27 = smov 32  }
   0x8   :  { %v115_v6 = vand.u32 %v113_v4, %v96_v5  ;;  %v2090_v8 = vld [vmem:[%s2898_s0] sm:$0xff]  ;;  %v2091_v32 = vld [vmem:[%s2898_s0 + $0x8] sm:$0xff]  ;;  %v2395_v33 = vld [vmem:[%s2901_s3 + $0x18] sm:$0xff]  ;;  %vm155_vm6 = vcmask 261120   ;;  %s2283_s17 = smov [#allocation5]   ;;  %s1918_s19 = sshll.u32 %s2913_s15, 4  ;;  %s1919_s19 = int_to_ptr.hbm [resolvable:$true] %s1918_s19 }
   0x9   :  { %v2380_v9 = vld [vmem:[%s2902_s4] ss:$0 sm:$0xff]  ;;  %v2401_v34 = vld [vmem:[%s2901_s3 + $0x10] sm:$0xff]  ;;  %v2407_v35 = vld [vmem:[%s2901_s3 + $0x8] sm:$0xff] }
   0xa   :  { %123 = vmatpush.bf16.msra.mxu0 %v115_v6  ;;  %2110 = vmatpush.bf16.msra.mxu1 %v115_v6  ;;  %v2412_v36 = vld [vmem:[%s2903_s5 + $0x18] sm:$0xff]  ;;  %v2419_v37 = vld [vmem:[%s2903_s5 + $0x10] sm:$0xff]  ;;  %v2424_v38 = vld [vmem:[%s2901_s3] sm:$0xff] }
   0xb   :  { %v2429_v39 = vld [vmem:[%s2903_s5 + $0x8] sm:$0xff]  ;;  %405 = vmatpush.msra.mxu2 %v2412_v36  ;;  %v2437_v40 = vld [vmem:[%s2903_s5] sm:$0xff]  ;;  %v2092_v41 = vld [vmem:[%s2898_s0 + $0x10] sm:$0xff] }
   0xc   :  { %v2093_v44 = vld [vmem:[%s2898_s0 + $0x18] sm:$0xff]  ;;  %v2484_v56 = vld [vmem:[%s2905_s7] ss:$0 sm:$0xff]  ;;  %s1916_s0 = sshll.u32 %s2283_s17, 4  ;;  %s1917_s0 = int_to_ptr.vmem [resolvable:$true] %s1916_s0 }
   0xd   :  { %406 = vmatpush.msra.mxu2 %v2419_v37 }
   0xe   :  { %124 = vmatpush.bf16.msra.mxu0 %v2094_v7  ;;  %2111 = vmatpush.bf16.msra.mxu1 %v2094_v7 }
   0xf   :  { %407 = vmatpush.msra.mxu2 %v2429_v39 }
  0x11   :  { %1947 = vmatmul.msk.bf16.vlgmr.msra.gmra.mxu0 %vm98_vm1, %v2090_v8  ;;  %1948 = vmatmul.msk.bf16.vlgmr.msra.gmra.mxu1 %vm98_vm1, %v2091_v32 }
  0x12   :  { %236 = vmatpush.msrb.mxu1 %v2395_v33  ;;  %256 = vmatpush.msrb.mxu0 %v2412_v36 }
  0x13   :  { %408 = vmatpush.msra.mxu2 %v2437_v40 }
  0x14   :  { %237 = vmatpush.msrb.mxu1 %v2401_v34  ;;  %257 = vmatpush.msrb.mxu0 %v2419_v37 }
  0x15   :  { %556 = vmatpush.msrb.mxu2 %v2412_v36 }
  0x16   :  { %238 = vmatpush.msrb.mxu1 %v2407_v35  ;;  %258 = vmatpush.msrb.mxu0 %v2429_v39 }
  0x17   :  { %557 = vmatpush.msrb.mxu2 %v2419_v37 }
  0x18   :  { %239 = vmatpush.msrb.mxu1 %v2424_v38  ;;  %259 = vmatpush.msrb.mxu0 %v2437_v40 }
  0x19   :  { %558 = vmatpush.msrb.mxu2 %v2429_v39 }
  0x1a   :  { %385 = vmatpush.msra.mxu1 %v2395_v33 }
  0x1b   :  { %559 = vmatpush.msrb.mxu2 %v2437_v40 }
  0x1c   :  { %386 = vmatpush.msra.mxu1 %v2401_v34 }
  0x1e   :  { %387 = vmatpush.msra.mxu1 %v2407_v35 }
  0x20   :  { %388 = vmatpush.msra.mxu1 %v2424_v38 }
  0x21   :  { %1949 = vmatmul.msk.bf16.gmra.mxu1 %vm98_vm1, %v2092_v41 }
  0x31   :  { %1950 = vmatmul.msk.bf16.gmra.mxu1 %vm98_vm1, %v2093_v44 }
  0x8e   :  { %v126_v10 = vpop.f32.mrf.mxu0  ;;  %v2468_v46 = vpop.f32.mrf.mxu1 }
  0x8f   :  { %v127_v11 = vadd.f32 %v2380_v9, %v126_v10 }
  0x91   :  { %2123 = vtanh.f32 %v127_v11  ;;  %v1951_v13 = vmul.f32 -1.442695, %v127_v11 }
  0x93   :  { %2125 = vpow2.f32 %v1951_v13 }
  0x96   :  { %v2470_v47 = vpop.f32.mrf.mxu1  ;;  %v128_v52 = vpop.f32.mrf.mxu0 }
  0x97   :  { %v2124_v12 = vpop.eup %2123  ;;  %v129_v53 = vadd.f32 %v2380_v9, %v128_v52 }
  0x98   :  { %204 = vrot.lane.b32.xlu0 %v2124_v12, %s2280_s2 }
  0x99   :  { %v2126_v14 = vpop.eup %2125 }
  0x9a   :  { %v185_v15 = vadd.f32 1.0, %v2126_v14 }
  0x9c   :  { %2127 = vrcp.f32 %v185_v15  ;;  %v197_v21 = vand.u32 2147483648, %v185_v15  ;;  %vm191_vm3 = vweird.f32 %v185_v15  ;;  %v195_v22 = vand.u32 2147483647, %v185_v15 }
  0x9e   :  { %v198_v24 = vor.u32 1.1754944e-38, %v197_v21  ;;  %vm196_vm5 = vcmp.eq.f32.partialorder %v195_v22, 8.507059e+37  ;;  %v2472_v48 = vpop.f32.mrf.mxu1 }
  0xa2   :  { %v2128_v16 = vpop.eup %2127 }
  0xa3   :  { %v187_v17 = vmul.f32 %v2128_v16, %v185_v15  ;;  %vm192_vm2 = vweird.f32 %v2128_v16 }
  0xa4   :  { %vm193_vm4 = vmor %vm191_vm3, %vm192_vm2 }
  0xa5   :  { %v188_v18 = vsub.f32 1.0, %v187_v17 }
  0xa6   :  { %v2474_v49 = vpop.f32.mrf.mxu1 }
  0xa7   :  { %v189_v19 = vmul.f32 %v2128_v16, %v188_v18 }
  0xa9   :  { %v190_v20 = vadd.f32 %v2128_v16, %v189_v19 }
  0xab   :  { %v194_v23 = vsel %vm193_vm4, %v2128_v16, %v190_v20 }
  0xac   :  { %v199_v26 = vsel %vm196_vm5, %v198_v24, %v194_v23 }
  0xad   :  { %v202_v28 = vmul.f32 0.0, %v199_v26 }
  0xae   :  { %v2476_v50 = vpop.f32.mrf.mxu1 }
  0xb6   :  { %v2478_v51 = vpop.f32.mrf.mxu1 }
 0x10a   :  { %v205_v25 = vpop.permute.xlu0 %204 }
 0x10b   :  { %v207_v27 = vmul.f32 %v205_v25, %v199_v26 }
 0x10d   :  { %209 = vrot.lane.b32.xlu0 %v207_v27, %s2281_s27 }
 0x17f   :  { %v210_v29 = vpop.permute.xlu0 %209 }
 0x180   :  { %v2385_v30 = vadd.f32 %v210_v29, %v202_v28 }
 0x182   :  { %2129 = vtanh.f32 %v2385_v30 }
 0x188   :  { %v2130_v31 = vpop.eup %2129 }
 0x189   :  { %215 = vrot.lane.b32.xlu1 %v2130_v31, %s2280_s2 }
 0x1fb   :  { %v216_v42 = vpop.permute.xlu1 %215 }
 0x1fc   :  { %v218_v43 = vmul.f32 %v216_v42, %v199_v26 }
 0x1fe   :  { %220 = vrot.lane.b32.xlu1 %v218_v43, %s2281_s27 }
 0x270   :  { %v221_v45 = vpop.permute.xlu1 %220 }
 0x271   :  { %1952 = vmatmul.msk.f32.vlgmr.msrb.gmra.mxu1 %vm155_vm6, %v221_v45  ;;  %1953 = vmatmul.msk.f32.vlgmr.msrb.gmra.mxu0 %vm155_vm6, %v221_v45 }
 0x272   :  { %536 = vmatpush.msrb.mxu1 %v2395_v33 }
 0x274   :  { %537 = vmatpush.msrb.mxu1 %v2401_v34 }
 0x276   :  { %538 = vmatpush.msrb.mxu1 %v2407_v35 }
 0x278   :  { %539 = vmatpush.msrb.mxu1 %v2424_v38 }
 0x2ee   :  { %v241_v54 = vpop.f32.mrf.mxu1  ;;  %v261_v57 = vpop.f32.mrf.mxu0 }
 0x2ef   :  { %v330_v55 = vadd.f32 %v241_v54, %v129_v53  ;;  %v262_v58 = vadd.f32 %v2484_v56, %v261_v57  ;;  %v2505_v54 = vld [vmem:[%s2904_s6 + $0x18] sm:$0xff]  ;;  %v2517_v57 = vld [vmem:[%s2904_s6 + $0x8] sm:$0xff] }
 0x2f0   :  { %318 = vmatpush.msra.mxu0 %v2505_v54  ;;  %468 = vmatpush.msra.mxu3 %v2505_v54 }
 0x2f1   :  { %2131 = vtanh.f32 %v330_v55  ;;  %v1956_v61 = vmul.f32 -1.442695, %v330_v55  ;;  %v1954_v62 = vmul.f32 -1.442695, %v262_v58  ;;  %v2510_v55 = vld [vmem:[%s2904_s6 + $0x10] sm:$0xff] }
 0x2f2   :  { %2133 = vtanh.f32 %v262_v58  ;;  %319 = vmatpush.msra.mxu0 %v2510_v55  ;;  %469 = vmatpush.msra.mxu3 %v2510_v55  ;;  %v2524_v58 = vld [vmem:[%s2904_s6] sm:$0xff] }
 0x2f3   :  { %2135 = vpow2.f32 %v1956_v61  ;;  %v132_v61 = vadd.f32 %v2380_v9, %v2468_v46 }
 0x2f4   :  { %2137 = vpow2.f32 %v1954_v62  ;;  %320 = vmatpush.msra.mxu0 %v2517_v57  ;;  %470 = vmatpush.msra.mxu3 %v2517_v57 }
 0x2f6   :  { %321 = vmatpush.msra.mxu0 %v2524_v58  ;;  %471 = vmatpush.msra.mxu3 %v2524_v58 }
 0x2f7   :  { %v2132_v59 = vpop.eup %2131 }
 0x2f8   :  { %353 = vrot.lane.b32.xlu2 %v2132_v59, %s2280_s2  ;;  %v2134_v60 = vpop.eup %2133  ;;  %619 = vmatpush.msrb.mxu3 %v2505_v54 }
 0x2f9   :  { %v2136_v63 = vpop.eup %2135 }
 0x2fa   :  { %v334_v0 = vadd.f32 1.0, %v2136_v63  ;;  %v2138_v1 = vpop.eup %2137  ;;  %620 = vmatpush.msrb.mxu3 %v2510_v55 }
 0x2fb   :  { %v267_v2 = vadd.f32 1.0, %v2138_v1 }
 0x2fc   :  { %2139 = vrcp.f32 %v334_v0  ;;  %v346_v12 = vand.u32 2147483648, %v334_v0  ;;  %vm340_vm8 = vweird.f32 %v334_v0  ;;  %v344_v13 = vand.u32 2147483647, %v334_v0  ;;  %621 = vmatpush.msrb.mxu3 %v2517_v57 }
 0x2fd   :  { %2141 = vrcp.f32 %v267_v2  ;;  %v279_v21 = vand.u32 2147483648, %v267_v2  ;;  %vm273_vm12 = vweird.f32 %v267_v2  ;;  %v277_v22 = vand.u32 2147483647, %v267_v2 }
 0x2fe   :  { %v347_v16 = vor.u32 1.1754944e-38, %v346_v12  ;;  %vm345_vm10 = vcmp.eq.f32.partialorder %v344_v13, 8.507059e+37  ;;  %622 = vmatpush.msrb.mxu3 %v2524_v58 }
 0x2ff   :  { %v280_v24 = vor.u32 1.1754944e-38, %v279_v21  ;;  %vm278_vm14 = vcmp.eq.f32.partialorder %v277_v22, 8.507059e+37 }
 0x300   :  { %286 = vrot.lane.b32.xlu2 %v2134_v60, %s2280_s2 }
 0x302   :  { %v2140_v3 = vpop.eup %2139 }
 0x303   :  { %v336_v4 = vmul.f32 %v2140_v3, %v334_v0  ;;  %v2142_v6 = vpop.eup %2141  ;;  %vm341_vm7 = vweird.f32 %v2140_v3 }
 0x304   :  { %v269_v8 = vmul.f32 %v2142_v6, %v267_v2  ;;  %vm342_vm9 = vmor %vm340_vm8, %vm341_vm7  ;;  %vm274_vm11 = vweird.f32 %v2142_v6 }
 0x305   :  { %v337_v5 = vsub.f32 1.0, %v336_v4  ;;  %vm275_vm13 = vmor %vm273_vm12, %vm274_vm11 }
 0x306   :  { %v270_v11 = vsub.f32 1.0, %v269_v8 }
 0x307   :  { %v338_v7 = vmul.f32 %v2140_v3, %v337_v5 }
 0x308   :  { %v271_v15 = vmul.f32 %v2142_v6, %v270_v11 }
 0x309   :  { %v339_v10 = vadd.f32 %v2140_v3, %v338_v7 }
 0x30a   :  { %v272_v20 = vadd.f32 %v2142_v6, %v271_v15 }
 0x30b   :  { %v343_v14 = vsel %vm342_vm9, %v2140_v3, %v339_v10 }
 0x30c   :  { %v348_v18 = vsel %vm345_vm10, %v347_v16, %v343_v14  ;;  %v276_v23 = vsel %vm275_vm13, %v2142_v6, %v272_v20 }
 0x30d   :  { %v281_v25 = vsel %vm278_vm14, %v280_v24, %v276_v23  ;;  %v351_v28 = vmul.f32 %v348_v18, %v2385_v30 }
 0x30e   :  { %v284_v32 = vmul.f32 0.0, %v281_v25 }
 0x352   :  { %v354_v17 = vpop.permute.xlu2 %353 }
 0x353   :  { %v356_v19 = vmul.f32 %v354_v17, %v348_v18 }
 0x355   :  { %358 = vrot.lane.b32.xlu0 %v356_v19, %s2281_s27 }
 0x35a   :  { %v287_v26 = vpop.permute.xlu2 %286 }
 0x35b   :  { %v289_v27 = vmul.f32 %v287_v26, %v281_v25 }
 0x35d   :  { %291 = vrot.lane.b32.xlu1 %v289_v27, %s2281_s27 }
 0x3c7   :  { %v359_v29 = vpop.permute.xlu0 %358 }
 0x3c8   :  { %v2492_v31 = vadd.f32 %v359_v29, %v351_v28 }
 0x3ca   :  { %2143 = vtanh.f32 %v2492_v31 }
 0x3cf   :  { %v292_v41 = vpop.permute.xlu1 %291 }
 0x3d0   :  { %v2144_v42 = vpop.eup %2143  ;;  %v2495_v43 = vadd.f32 %v292_v41, %v284_v32 }
 0x3d1   :  { %364 = vrot.lane.b32.xlu2 %v2144_v42, %s2280_s2 }
 0x3d2   :  { %2145 = vtanh.f32 %v2495_v43 }
 0x3d8   :  { %v2146_v44 = vpop.eup %2145 }
 0x3d9   :  { %297 = vrot.lane.b32.xlu0 %v2146_v44, %s2280_s2 }
 0x42b   :  { %v365_v45 = vpop.permute.xlu2 %364 }
 0x42c   :  { %v367_v52 = vmul.f32 %v365_v45, %v348_v18 }
 0x42e   :  { %369 = vrot.lane.b32.xlu1 %v367_v52, %s2281_s27 }
 0x44b   :  { %v298_v30 = vpop.permute.xlu0 %297 }
 0x44c   :  { %v300_v53 = vmul.f32 %v298_v30, %v281_v25 }
 0x44e   :  { %302 = vrot.lane.b32.xlu2 %v300_v53, %s2281_s27 }
 0x4a0   :  { %v370_v59 = vpop.permute.xlu1 %369 }
 0x4a1   :  { %1957 = vmatmul.msk.f32.vlgmr.msra.gmra.mxu1 %vm155_vm6, %v370_v59  ;;  %1958 = vmatmul.msk.f32.vlgmr.msra.gmra.mxu2 %vm155_vm6, %v370_v59 }
 0x4a2   :  { %707 = vmatpush.msra.mxu2 %v2412_v36  ;;  %687 = vmatpush.msra.mxu1 %v2395_v33 }
 0x4a4   :  { %708 = vmatpush.msra.mxu2 %v2419_v37  ;;  %688 = vmatpush.msra.mxu1 %v2401_v34 }
 0x4a6   :  { %709 = vmatpush.msra.mxu2 %v2429_v39  ;;  %689 = vmatpush.msra.mxu1 %v2407_v35 }
 0x4a8   :  { %v303_v60 = vpop.permute.xlu2 %302  ;;  %710 = vmatpush.msra.mxu2 %v2437_v40  ;;  %690 = vmatpush.msra.mxu1 %v2424_v38 }
 0x4a9   :  { %327 = vst.msk [vmem:[#allocation3] sm:$0xff] %vm155_vm6, %v303_v60  ;;  %1955 = vmatmul.msk.f32.vlgmr.msra.gmra.mxu0 %vm155_vm6, %v303_v60 }
 0x51e   :  { %v390_v62 = vpop.f32.mrf.mxu1 }
 0x51f   :  { %v481_v63 = vadd.f32 %v390_v62, %v132_v61 }
 0x521   :  { %2147 = vtanh.f32 %v481_v63  ;;  %v1961_v6 = vmul.f32 -1.442695, %v481_v63 }
 0x524   :  { %v410_v0 = vpop.f32.mrf.mxu2 }
 0x526   :  { %v323_v1 = vpop.f32.mrf.mxu0 }
 0x527   :  { %v2148_v2 = vpop.eup %2147  ;;  %v411_v3 = vadd.f32 %v410_v0, %v323_v1 }
 0x528   :  { %504 = vrot.lane.b32.xlu1 %v2148_v2, %s2280_s2 }
 0x529   :  { %v413_v4 = vadd.f32 %v2484_v56, %v411_v3 }
 0x52b   :  { %2149 = vtanh.f32 %v413_v4  ;;  %v1959_v8 = vmul.f32 -1.442695, %v413_v4 }
 0x52c   :  { %2151 = vpow2.f32 %v1961_v6 }
 0x52d   :  { %2153 = vpow2.f32 %v1959_v8 }
 0x531   :  { %v2150_v5 = vpop.eup %2149 }
 0x532   :  { %436 = vrot.lane.b32.xlu0 %v2150_v5, %s2280_s2  ;;  %v2152_v7 = vpop.eup %2151  ;;  %v134_v5 = vadd.f32 %v2380_v9, %v2470_v47 }
 0x533   :  { %v485_v46 = vadd.f32 1.0, %v2152_v7  ;;  %v2154_v10 = vpop.eup %2153 }
 0x534   :  { %v417_v12 = vadd.f32 1.0, %v2154_v10 }
 0x535   :  { %2155 = vrcp.f32 %v485_v46  ;;  %v497_v19 = vand.u32 2147483648, %v485_v46  ;;  %vm491_vm0 = vweird.f32 %v485_v46  ;;  %v495_v20 = vand.u32 2147483647, %v485_v46 }
 0x536   :  { %2157 = vrcp.f32 %v417_v12  ;;  %v429_v29 = vand.u32 2147483648, %v417_v12  ;;  %vm423_vm4 = vweird.f32 %v417_v12  ;;  %v427_v32 = vand.u32 2147483647, %v417_v12 }
 0x537   :  { %v498_v23 = vor.u32 1.1754944e-38, %v497_v19  ;;  %vm496_vm2 = vcmp.eq.f32.partialorder %v495_v20, 8.507059e+37 }
 0x538   :  { %v430_v42 = vor.u32 1.1754944e-38, %v429_v29  ;;  %vm428_vm7 = vcmp.eq.f32.partialorder %v427_v32, 8.507059e+37 }
 0x53b   :  { %v2156_v11 = vpop.eup %2155 }
 0x53c   :  { %v487_v13 = vmul.f32 %v2156_v11, %v485_v46  ;;  %v2158_v15 = vpop.eup %2157  ;;  %vm492_vm15 = vweird.f32 %v2156_v11 }
 0x53d   :  { %v419_v17 = vmul.f32 %v2158_v15, %v417_v12  ;;  %vm493_vm1 = vmor %vm491_vm0, %vm492_vm15  ;;  %vm424_vm3 = vweird.f32 %v2158_v15 }
 0x53e   :  { %v488_v14 = vsub.f32 1.0, %v487_v13  ;;  %vm425_vm5 = vmor %vm423_vm4, %vm424_vm3 }
 0x53f   :  { %v420_v21 = vsub.f32 1.0, %v419_v17 }
 0x540   :  { %v489_v16 = vmul.f32 %v2156_v11, %v488_v14 }
 0x541   :  { %v421_v24 = vmul.f32 %v2158_v15, %v420_v21 }
 0x542   :  { %v490_v18 = vadd.f32 %v2156_v11, %v489_v16 }
 0x543   :  { %v422_v28 = vadd.f32 %v2158_v15, %v421_v24 }
 0x544   :  { %v494_v22 = vsel %vm493_vm1, %v2156_v11, %v490_v18 }
 0x545   :  { %v499_v26 = vsel %vm496_vm2, %v498_v23, %v494_v22  ;;  %v426_v41 = vsel %vm425_vm5, %v2158_v15, %v422_v28 }
 0x546   :  { %v431_v45 = vsel %vm428_vm7, %v430_v42, %v426_v41  ;;  %v502_v61 = vmul.f32 %v499_v26, %v2492_v31 }
 0x547   :  { %v434_v30 = vmul.f32 %v431_v45, %v2495_v43 }
 0x59a   :  { %v505_v25 = vpop.permute.xlu1 %504 }
 0x59b   :  { %v507_v27 = vmul.f32 %v505_v25, %v499_v26 }
 0x59d   :  { %509 = vrot.lane.b32.xlu0 %v507_v27, %s2281_s27 }
 0x5a4   :  { %v437_v44 = vpop.permute.xlu0 %436 }
 0x5a5   :  { %v439_v52 = vmul.f32 %v437_v44, %v431_v45 }
 0x5a7   :  { %441 = vrot.lane.b32.xlu2 %v439_v52, %s2281_s27 }
 0x601   :  { %v442_v53 = vpop.permute.xlu2 %441 }
 0x602   :  { %v2554_v59 = vadd.f32 %v442_v53, %v434_v30 }
 0x604   :  { %2159 = vtanh.f32 %v2554_v59 }
 0x60a   :  { %v2160_v60 = vpop.eup %2159 }
 0x60b   :  { %447 = vrot.lane.b32.xlu1 %v2160_v60, %s2280_s2 }
 0x60f   :  { %v510_v62 = vpop.permute.xlu0 %509 }
 0x610   :  { %v2559_v63 = vadd.f32 %v510_v62, %v502_v61 }
 0x612   :  { %2161 = vtanh.f32 %v2559_v63 }
 0x618   :  { %v2162_v0 = vpop.eup %2161 }
 0x619   :  { %515 = vrot.lane.b32.xlu2 %v2162_v0, %s2280_s2 }
 0x673   :  { %v516_v1 = vpop.permute.xlu2 %515 }
 0x674   :  { %v518_v43 = vmul.f32 %v516_v1, %v499_v26 }
 0x676   :  { %520 = vrot.lane.b32.xlu1 %v518_v43, %s2281_s27 }
 0x67d   :  { %v448_v2 = vpop.permute.xlu1 %447 }
 0x67e   :  { %v450_v3 = vmul.f32 %v448_v2, %v431_v45 }
 0x680   :  { %452 = vrot.lane.b32.xlu0 %v450_v3, %s2281_s27 }
 0x6e8   :  { %v521_v4 = vpop.permute.xlu1 %520 }
 0x6e9   :  { %1962 = vmatmul.msk.f32.vlgmr.msrb.gmra.mxu1 %vm155_vm6, %v521_v4  ;;  %1963 = vmatmul.msk.f32.vlgmr.msrb.gmra.mxu2 %vm155_vm6, %v521_v4 }
 0x6ea   :  { %838 = vmatpush.msrb.mxu1 %v2395_v33  ;;  %858 = vmatpush.msrb.mxu2 %v2412_v36 }
 0x6ec   :  { %839 = vmatpush.msrb.mxu1 %v2401_v34  ;;  %859 = vmatpush.msrb.mxu2 %v2419_v37 }
 0x6ee   :  { %840 = vmatpush.msrb.mxu1 %v2407_v35  ;;  %860 = vmatpush.msrb.mxu2 %v2429_v39 }
 0x6f0   :  { %841 = vmatpush.msrb.mxu1 %v2424_v38  ;;  %861 = vmatpush.msrb.mxu2 %v2437_v40 }
 0x6f2   :  { %v453_v31 = vpop.permute.xlu0 %452 }
 0x6f3   :  { %478 = vst.msk [vmem:[#allocation3 + $0x8] sm:$0xff] %vm155_vm6, %v453_v31  ;;  %1960 = vmatmul.msk.f32.vlgmr.msra.gmra.mxu3 %vm155_vm6, %v453_v31 }
 0x6f4   :  { %770 = vmatpush.msra.mxu3 %v2505_v54 }
 0x6f6   :  { %771 = vmatpush.msra.mxu3 %v2510_v55 }
 0x6f8   :  { %772 = vmatpush.msra.mxu3 %v2517_v57 }
 0x6fa   :  { %773 = vmatpush.msra.mxu3 %v2524_v58 }
 0x766   :  { %v541_v6 = vpop.f32.mrf.mxu1 }
 0x767   :  { %v632_v7 = vadd.f32 %v541_v6, %v134_v5 }
 0x769   :  { %2163 = vtanh.f32 %v632_v7  ;;  %v1966_v15 = vmul.f32 -1.442695, %v632_v7 }
 0x76c   :  { %v561_v46 = vpop.f32.mrf.mxu2 }
 0x76f   :  { %v2164_v8 = vpop.eup %2163 }
 0x770   :  { %655 = vrot.lane.b32.xlu0 %v2164_v8, %s2280_s2 }
 0x776   :  { %v473_v10 = vpop.f32.mrf.mxu3 }
 0x777   :  { %v562_v11 = vadd.f32 %v561_v46, %v473_v10 }
 0x779   :  { %v564_v12 = vadd.f32 %v2484_v56, %v562_v11 }
 0x77b   :  { %2165 = vtanh.f32 %v564_v12  ;;  %v1964_v14 = vmul.f32 -1.442695, %v564_v12  ;;  %v137_v12 = vadd.f32 %v2380_v9, %v2472_v48 }
 0x77d   :  { %2167 = vpow2.f32 %v1964_v14 }
 0x77e   :  { %2169 = vpow2.f32 %v1966_v15 }
 0x781   :  { %v2166_v13 = vpop.eup %2165 }
 0x782   :  { %587 = vrot.lane.b32.xlu2 %v2166_v13, %s2280_s2 }
 0x783   :  { %v2168_v16 = vpop.eup %2167 }
 0x784   :  { %v568_v47 = vadd.f32 1.0, %v2168_v16  ;;  %v2170_v17 = vpop.eup %2169 }
 0x785   :  { %v636_v18 = vadd.f32 1.0, %v2170_v17 }
 0x786   :  { %2171 = vrcp.f32 %v568_v47  ;;  %v580_v27 = vand.u32 2147483648, %v568_v47  ;;  %vm574_vm9 = vweird.f32 %v568_v47  ;;  %v578_v28 = vand.u32 2147483647, %v568_v47 }
 0x787   :  { %2173 = vrcp.f32 %v636_v18  ;;  %v648_v52 = vand.u32 2147483648, %v636_v18  ;;  %vm642_vm13 = vweird.f32 %v636_v18  ;;  %v646_v53 = vand.u32 2147483647, %v636_v18 }
 0x788   :  { %v581_v41 = vor.u32 1.1754944e-38, %v580_v27  ;;  %vm579_vm11 = vcmp.eq.f32.partialorder %v578_v28, 8.507059e+37 }
 0x789   :  { %v649_v61 = vor.u32 1.1754944e-38, %v648_v52  ;;  %vm647_vm15 = vcmp.eq.f32.partialorder %v646_v53, 8.507059e+37 }
 0x78c   :  { %v2172_v19 = vpop.eup %2171 }
 0x78d   :  { %v570_v20 = vmul.f32 %v2172_v19, %v568_v47  ;;  %v2174_v21 = vpop.eup %2173  ;;  %vm575_vm8 = vweird.f32 %v2172_v19 }
 0x78e   :  { %v638_v23 = vmul.f32 %v2174_v21, %v636_v18  ;;  %vm576_vm10 = vmor %vm574_vm9, %vm575_vm8  ;;  %vm643_vm12 = vweird.f32 %v2174_v21 }
 0x78f   :  { %v571_v22 = vsub.f32 1.0, %v570_v20  ;;  %vm644_vm14 = vmor %vm642_vm13, %vm643_vm12 }
 0x790   :  { %v639_v25 = vsub.f32 1.0, %v638_v23 }
 0x791   :  { %v572_v24 = vmul.f32 %v2172_v19, %v571_v22 }
 0x792   :  { %v640_v29 = vmul.f32 %v2174_v21, %v639_v25 }
 0x793   :  { %v573_v26 = vadd.f32 %v2172_v19, %v572_v24 }
 0x794   :  { %v641_v42 = vadd.f32 %v2174_v21, %v640_v29 }
 0x795   :  { %v577_v32 = vsel %vm576_vm10, %v2172_v19, %v573_v26 }
 0x796   :  { %v582_v45 = vsel %vm579_vm11, %v581_v41, %v577_v32  ;;  %v645_v60 = vsel %vm644_vm14, %v2174_v21, %v641_v42 }
 0x797   :  { %v650_v0 = vsel %vm647_vm15, %v649_v61, %v645_v60  ;;  %v585_v31 = vmul.f32 %v582_v45, %v2554_v59 }
 0x798   :  { %v653_v43 = vmul.f32 %v650_v0, %v2559_v63 }
 0x7dc   :  { %v588_v44 = vpop.permute.xlu2 %587 }
 0x7dd   :  { %v590_v30 = vmul.f32 %v588_v44, %v582_v45 }
 0x7df   :  { %592 = vrot.lane.b32.xlu1 %v590_v30, %s2281_s27 }
 0x7e2   :  { %v656_v62 = vpop.permute.xlu0 %655 }
 0x7e3   :  { %v658_v1 = vmul.f32 %v656_v62, %v650_v0 }
 0x7e5   :  { %660 = vrot.lane.b32.xlu2 %v658_v1, %s2281_s27 }
 0x83f   :  { %v661_v2 = vpop.permute.xlu2 %660 }
 0x840   :  { %v2589_v3 = vadd.f32 %v661_v2, %v653_v43 }
 0x842   :  { %2175 = vtanh.f32 %v2589_v3 }
 0x848   :  { %v2176_v4 = vpop.eup %2175 }
 0x849   :  { %666 = vrot.lane.b32.xlu1 %v2176_v4, %s2280_s2 }
 0x851   :  { %v593_v5 = vpop.permute.xlu1 %592 }
 0x852   :  { %v2594_v6 = vadd.f32 %v593_v5, %v585_v31 }
 0x854   :  { %2177 = vtanh.f32 %v2594_v6 }
 0x85a   :  { %v2178_v7 = vpop.eup %2177 }
 0x85b   :  { %598 = vrot.lane.b32.xlu0 %v2178_v7, %s2280_s2 }
 0x8bb   :  { %v667_v8 = vpop.permute.xlu1 %666 }
 0x8bc   :  { %v669_v63 = vmul.f32 %v667_v8, %v650_v0 }
 0x8be   :  { %671 = vrot.lane.b32.xlu0 %v669_v63, %s2281_s27 }
 0x8cd   :  { %v599_v46 = vpop.permute.xlu0 %598 }
 0x8ce   :  { %v601_v10 = vmul.f32 %v599_v46, %v582_v45 }
 0x8d0   :  { %603 = vrot.lane.b32.xlu2 %v601_v10, %s2281_s27 }
 0x92a   :  { %v604_v11 = vpop.permute.xlu2 %603 }
 0x92b   :  { %629 = vst.msk [vmem:[#allocation3 + $0x10] sm:$0xff] %vm155_vm6, %v604_v11  ;;  %1965 = vmatmul.msk.f32.vlgmr.msrb.gmra.mxu3 %vm155_vm6, %v604_v11 }
 0x92c   :  { %921 = vmatpush.msrb.mxu3 %v2505_v54 }
 0x92e   :  { %922 = vmatpush.msrb.mxu3 %v2510_v55 }
 0x930   :  { %v672_v59 = vpop.permute.xlu0 %671  ;;  %923 = vmatpush.msrb.mxu3 %v2517_v57 }
 0x931   :  { %1967 = vmatmul.msk.f32.vlgmr.msra.gmra.mxu1 %vm155_vm6, %v672_v59  ;;  %1968 = vmatmul.msk.f32.vlgmr.msra.gmra.mxu2 %vm155_vm6, %v672_v59 }
 0x932   :  { %989 = vmatpush.msra.mxu1 %v2395_v33  ;;  %1009 = vmatpush.msra.mxu2 %v2412_v36 }
 0x933   :  { %924 = vmatpush.msrb.mxu3 %v2524_v58 }
 0x934   :  { %990 = vmatpush.msra.mxu1 %v2401_v34  ;;  %1010 = vmatpush.msra.mxu2 %v2419_v37 }
 0x936   :  { %991 = vmatpush.msra.mxu1 %v2407_v35  ;;  %1011 = vmatpush.msra.mxu2 %v2429_v39 }
 0x938   :  { %992 = vmatpush.msra.mxu1 %v2424_v38  ;;  %1012 = vmatpush.msra.mxu2 %v2437_v40 }
 0x9ae   :  { %v692_v13 = vpop.f32.mrf.mxu1  ;;  %v624_v15 = vpop.f32.mrf.mxu3 }
 0x9af   :  { %v783_v14 = vadd.f32 %v692_v13, %v137_v12 }
 0x9b1   :  { %2179 = vtanh.f32 %v783_v14  ;;  %v1971_v20 = vmul.f32 -1.442695, %v783_v14 }
 0x9b4   :  { %v712_v16 = vpop.f32.mrf.mxu2 }
 0x9b5   :  { %v713_v47 = vadd.f32 %v712_v16, %v624_v15 }
 0x9b7   :  { %v2180_v17 = vpop.eup %2179  ;;  %v715_v18 = vadd.f32 %v2484_v56, %v713_v47 }
 0x9b8   :  { %806 = vrot.lane.b32.xlu2 %v2180_v17, %s2280_s2 }
 0x9b9   :  { %2181 = vtanh.f32 %v715_v18  ;;  %v1969_v25 = vmul.f32 -1.442695, %v715_v18 }
 0x9ba   :  { %2183 = vpow2.f32 %v1971_v20 }
 0x9bf   :  { %v2182_v19 = vpop.eup %2181 }
 0x9c0   :  { %738 = vrot.lane.b32.xlu1 %v2182_v19, %s2280_s2  ;;  %v2184_v21 = vpop.eup %2183 }
 0x9c1   :  { %v787_v22 = vadd.f32 1.0, %v2184_v21 }
 0x9c3   :  { %2185 = vrcp.f32 %v787_v22  ;;  %v799_v28 = vand.u32 2147483648, %v787_v22  ;;  %vm793_vm1 = vweird.f32 %v787_v22  ;;  %v797_v29 = vand.u32 2147483647, %v787_v22 }
 0x9c4   :  { %2187 = vpow2.f32 %v1969_v25 }
 0x9c5   :  { %v800_v42 = vor.u32 1.1754944e-38, %v799_v28  ;;  %vm798_vm3 = vcmp.eq.f32.partialorder %v797_v29, 8.507059e+37 }
 0x9c9   :  { %v2186_v48 = vpop.eup %2185 }
 0x9ca   :  { %v789_v23 = vmul.f32 %v2186_v48, %v787_v22  ;;  %vm794_vm0 = vweird.f32 %v2186_v48  ;;  %v2188_v32 = vpop.eup %2187 }
 0x9cb   :  { %vm795_vm2 = vmor %vm793_vm1, %vm794_vm0  ;;  %v719_v44 = vadd.f32 1.0, %v2188_v32 }
 0x9cc   :  { %v790_v24 = vsub.f32 1.0, %v789_v23 }
 0x9cd   :  { %2189 = vrcp.f32 %v719_v44  ;;  %v731_v1 = vand.u32 2147483648, %v719_v44  ;;  %vm725_vm5 = vweird.f32 %v719_v44  ;;  %v729_v43 = vand.u32 2147483647, %v719_v44 }
 0x9ce   :  { %v791_v26 = vmul.f32 %v2186_v48, %v790_v24 }
 0x9cf   :  { %v732_v4 = vor.u32 1.1754944e-38, %v731_v1  ;;  %vm730_vm8 = vcmp.eq.f32.partialorder %v729_v43, 8.507059e+37 }
 0x9d0   :  { %v792_v27 = vadd.f32 %v2186_v48, %v791_v26 }
 0x9d2   :  { %v796_v41 = vsel %vm795_vm2, %v2186_v48, %v792_v27 }
 0x9d3   :  { %v801_v52 = vsel %vm798_vm3, %v800_v42, %v796_v41  ;;  %v2190_v53 = vpop.eup %2189 }
 0x9d4   :  { %v721_v60 = vmul.f32 %v2190_v53, %v719_v44  ;;  %vm726_vm4 = vweird.f32 %v2190_v53  ;;  %v804_v8 = vmul.f32 %v801_v52, %v2589_v3 }
 0x9d5   :  { %vm727_vm7 = vmor %vm725_vm5, %vm726_vm4 }
 0x9d6   :  { %v722_v61 = vsub.f32 1.0, %v721_v60 }
 0x9d8   :  { %v723_v62 = vmul.f32 %v2190_v53, %v722_v61 }
 0x9da   :  { %v724_v0 = vadd.f32 %v2190_v53, %v723_v62 }
 0x9dc   :  { %v728_v2 = vsel %vm727_vm7, %v2190_v53, %v724_v0 }
 0x9dd   :  { %v733_v5 = vsel %vm730_vm8, %v732_v4, %v728_v2 }
 0x9de   :  { %v736_v11 = vmul.f32 %v733_v5, %v2594_v6 }
 0xa12   :  { %v807_v45 = vpop.permute.xlu2 %806 }
 0xa13   :  { %v809_v30 = vmul.f32 %v807_v45, %v801_v52 }
 0xa15   :  { %811 = vrot.lane.b32.xlu1 %v809_v30, %s2281_s27 }
 0xa32   :  { %v739_v31 = vpop.permute.xlu1 %738 }
 0xa33   :  { %v741_v7 = vmul.f32 %v739_v31, %v733_v5 }
 0xa35   :  { %743 = vrot.lane.b32.xlu0 %v741_v7, %s2281_s27 }
 0xa87   :  { %v812_v63 = vpop.permute.xlu1 %811 }
 0xa88   :  { %v2624_v46 = vadd.f32 %v812_v63, %v804_v8 }
 0xa8a   :  { %2191 = vtanh.f32 %v2624_v46 }
 0xa90   :  { %v2192_v10 = vpop.eup %2191 }
 0xa91   :  { %817 = vrot.lane.b32.xlu0 %v2192_v10, %s2280_s2 }
 0xaa7   :  { %v744_v59 = vpop.permute.xlu0 %743 }
 0xaa8   :  { %v2629_v12 = vadd.f32 %v744_v59, %v736_v11 }
 0xaaa   :  { %2193 = vtanh.f32 %v2629_v12 }
 0xab0   :  { %v2194_v13 = vpop.eup %2193 }
 0xab1   :  { %749 = vrot.lane.b32.xlu2 %v2194_v13, %s2280_s2 }
 0xb03   :  { %v818_v14 = vpop.permute.xlu0 %817 }
 0xb04   :  { %v820_v3 = vmul.f32 %v818_v14, %v801_v52 }
 0xb06   :  { %822 = vrot.lane.b32.xlu2 %v820_v3, %s2281_s27 }
 0xb0b   :  { %v750_v15 = vpop.permute.xlu2 %749 }
 0xb0c   :  { %v752_v16 = vmul.f32 %v750_v15, %v733_v5 }
 0xb0e   :  { %754 = vrot.lane.b32.xlu1 %v752_v16, %s2281_s27 }
 0xb60   :  { %v823_v47 = vpop.permute.xlu2 %822 }
 0xb61   :  { %1972 = vmatmul.msk.f32.vlgmr.msrb.gmra.mxu1 %vm155_vm6, %v823_v47  ;;  %1973 = vmatmul.msk.f32.vlgmr.msrb.gmra.mxu2 %vm155_vm6, %v823_v47 }
 0xb62   :  { %1140 = vmatpush.msrb.mxu1 %v2395_v33  ;;  %1160 = vmatpush.msrb.mxu2 %v2412_v36  ;;  %v139_v33 = vadd.f32 %v2380_v9, %v2474_v49 }
 0xb64   :  { %1141 = vmatpush.msrb.mxu1 %v2401_v34  ;;  %1161 = vmatpush.msrb.mxu2 %v2419_v37 }
 0xb66   :  { %1142 = vmatpush.msrb.mxu1 %v2407_v35  ;;  %1162 = vmatpush.msrb.mxu2 %v2429_v39 }
 0xb68   :  { %1143 = vmatpush.msrb.mxu1 %v2424_v38  ;;  %1163 = vmatpush.msrb.mxu2 %v2437_v40 }
 0xb80   :  { %v755_v6 = vpop.permute.xlu1 %754 }
 0xb81   :  { %780 = vst.msk [vmem:[#allocation3 + $0x18] sm:$0xff] %vm155_vm6, %v755_v6  ;;  %1970 = vmatmul.msk.f32.vlgmr.msra.gmra.mxu3 %vm155_vm6, %v755_v6 }
 0xb82   :  { %1072 = vmatpush.msra.mxu3 %v2505_v54 }
 0xb84   :  { %1073 = vmatpush.msra.mxu3 %v2510_v55 }
 0xb86   :  { %1074 = vmatpush.msra.mxu3 %v2517_v57 }
 0xb88   :  { %1075 = vmatpush.msra.mxu3 %v2524_v58 }
 0xbde   :  { %v843_v34 = vpop.f32.mrf.mxu1 }
 0xbdf   :  { %v934_v35 = vadd.f32 %v843_v34, %v139_v33 }
 0xbe1   :  { %2195 = vtanh.f32 %v934_v35  ;;  %v1976_v22 = vmul.f32 -1.442695, %v934_v35 }
 0xbe4   :  { %v863_v17 = vpop.f32.mrf.mxu2 }
 0xbe7   :  { %v2196_v38 = vpop.eup %2195 }
 0xbe8   :  { %957 = vrot.lane.b32.xlu1 %v2196_v38, %s2280_s2 }
 0xc04   :  { %v775_v18 = vpop.f32.mrf.mxu3 }
 0xc05   :  { %v864_v19 = vadd.f32 %v863_v17, %v775_v18 }
 0xc07   :  { %v866_v20 = vadd.f32 %v2484_v56, %v864_v19 }
 0xc09   :  { %2197 = vtanh.f32 %v866_v20  ;;  %v1974_v28 = vmul.f32 -1.442695, %v866_v20 }
 0xc0a   :  { %2199 = vpow2.f32 %v1976_v22 }
 0xc0f   :  { %v2198_v21 = vpop.eup %2197 }
 0xc10   :  { %889 = vrot.lane.b32.xlu0 %v2198_v21, %s2280_s2  ;;  %v2200_v48 = vpop.eup %2199 }
 0xc11   :  { %v938_v23 = vadd.f32 1.0, %v2200_v48 }
 0xc13   :  { %2201 = vrcp.f32 %v938_v23  ;;  %v950_v27 = vand.u32 2147483648, %v938_v23  ;;  %vm944_vm10 = vweird.f32 %v938_v23  ;;  %v948_v29 = vand.u32 2147483647, %v938_v23 }
 0xc14   :  { %2203 = vpow2.f32 %v1974_v28 }
 0xc15   :  { %v951_v41 = vor.u32 1.1754944e-38, %v950_v27  ;;  %vm949_vm12 = vcmp.eq.f32.partialorder %v948_v29, 8.507059e+37 }
 0xc19   :  { %v2202_v9 = vpop.eup %2201 }
 0xc1a   :  { %v940_v49 = vmul.f32 %v2202_v9, %v938_v23  ;;  %vm945_vm9 = vweird.f32 %v2202_v9  ;;  %v2204_v52 = vpop.eup %2203 }
 0xc1b   :  { %vm946_vm11 = vmor %vm944_vm10, %vm945_vm9  ;;  %v870_v30 = vadd.f32 1.0, %v2204_v52 }
 0xc1c   :  { %v941_v24 = vsub.f32 1.0, %v940_v49 }
 0xc1d   :  { %2205 = vrcp.f32 %v870_v30  ;;  %v882_v1 = vand.u32 2147483648, %v870_v30  ;;  %vm876_vm14 = vweird.f32 %v870_v30  ;;  %v880_v43 = vand.u32 2147483647, %v870_v30 }
 0xc1e   :  { %v942_v25 = vmul.f32 %v2202_v9, %v941_v24 }
 0xc1f   :  { %v883_v4 = vor.u32 1.1754944e-38, %v882_v1  ;;  %vm881_vm0 = vcmp.eq.f32.partialorder %v880_v43, 8.507059e+37 }
 0xc20   :  { %v943_v26 = vadd.f32 %v2202_v9, %v942_v25 }
 0xc22   :  { %v947_v32 = vsel %vm946_vm11, %v2202_v9, %v943_v26 }
 0xc23   :  { %v952_v44 = vsel %vm949_vm12, %v951_v41, %v947_v32  ;;  %v2206_v53 = vpop.eup %2205 }
 0xc24   :  { %v872_v60 = vmul.f32 %v2206_v53, %v870_v30  ;;  %vm877_vm13 = vweird.f32 %v2206_v53  ;;  %v955_v8 = vmul.f32 %v952_v44, %v2624_v46 }
 0xc25   :  { %vm878_vm15 = vmor %vm876_vm14, %vm877_vm13 }
 0xc26   :  { %v873_v61 = vsub.f32 1.0, %v872_v60 }
 0xc28   :  { %v874_v62 = vmul.f32 %v2206_v53, %v873_v61 }
 0xc2a   :  { %v875_v0 = vadd.f32 %v2206_v53, %v874_v62 }
 0xc2c   :  { %v879_v2 = vsel %vm878_vm15, %v2206_v53, %v875_v0 }
 0xc2d   :  { %v884_v5 = vsel %vm881_vm0, %v883_v4, %v879_v2 }
 0xc2e   :  { %v887_v59 = vmul.f32 %v884_v5, %v2629_v12 }
 0xc5a   :  { %v958_v42 = vpop.permute.xlu1 %957 }
 0xc5b   :  { %v960_v45 = vmul.f32 %v958_v42, %v952_v44 }
 0xc5d   :  { %962 = vrot.lane.b32.xlu0 %v960_v45, %s2281_s27 }
 0xc82   :  { %v890_v31 = vpop.permute.xlu0 %889 }
 0xc83   :  { %v892_v7 = vmul.f32 %v890_v31, %v884_v5 }
 0xc85   :  { %894 = vrot.lane.b32.xlu2 %v892_v7, %s2281_s27 }
 0xccf   :  { %v963_v63 = vpop.permute.xlu0 %962 }
 0xcd0   :  { %v2659_v10 = vadd.f32 %v963_v63, %v955_v8 }
 0xcd2   :  { %2207 = vtanh.f32 %v2659_v10 }
 0xcd8   :  { %v2208_v11 = vpop.eup %2207 }
 0xcd9   :  { %968 = vrot.lane.b32.xlu2 %v2208_v11, %s2280_s2  ;;  %v2105_v11 = vld [vmem:[%s2907_s9 + $0x8] sm:$0xff] }
 0xcdf   :  { %v895_v13 = vpop.permute.xlu2 %894 }
 0xce0   :  { %v2664_v14 = vadd.f32 %v895_v13, %v887_v59  ;;  %v2104_v59 = vld [vmem:[%s2907_s9] sm:$0xff] }
 0xce2   :  { %2209 = vtanh.f32 %v2664_v14 }
 0xce8   :  { %v2210_v3 = vpop.eup %2209 }
 0xce9   :  { %900 = vrot.lane.b32.xlu1 %v2210_v3, %s2280_s2  ;;  %v1359_v3 = vld [vmem:[#allocation3] sm:$0xff] }
 0xd33   :  { %v969_v15 = vpop.permute.xlu2 %968 }
 0xd34   :  { %v971_v46 = vmul.f32 %v969_v15, %v952_v44 }
 0xd36   :  { %973 = vrot.lane.b32.xlu1 %v971_v46, %s2281_s27  ;;  %v1362_v46 = vld [vmem:[#allocation3 + $0x18] sm:$0xff] }
 0xd5b   :  { %v901_v16 = vpop.permute.xlu1 %900 }
 0xd5c   :  { %v903_v47 = vmul.f32 %v901_v16, %v884_v5  ;;  %v1361_v16 = vld [vmem:[#allocation3 + $0x10] sm:$0xff] }
 0xd5e   :  { %905 = vrot.lane.b32.xlu0 %v903_v47, %s2281_s27  ;;  %v1376_v47 = vpack.c.bf16 %v1362_v46, %v1361_v16  ;;  %v2097_v46 = vld [vmem:[%s2899_s1 + $0x10] sm:$0xff]  ;;  %v2109_v16 = vld [vmem:[%s2909_s11 + $0x18] sm:$0xff] }
 0xd5f   :  { %1735 = vmatpush.bf16.msrb.mxu0 %v2109_v16 }
 0xda8   :  { %v974_v6 = vpop.permute.xlu1 %973 }
 0xda9   :  { %1977 = vmatmul.msk.f32.vlgmr.msra.gmra.mxu1 %vm155_vm6, %v974_v6  ;;  %1978 = vmatmul.msk.f32.vlgmr.msra.gmra.mxu2 %vm155_vm6, %v974_v6 }
 0xdaa   :  { %1291 = vmatpush.msra.mxu1 %v2412_v36  ;;  %v2685_v36 = vld [vmem:[%s2902_s4] ss:$0 sm:$0xff]  ;;  %1431 = vmatpush.bf16.msra.mxu2 %v2105_v11 }
 0xdac   :  { %1292 = vmatpush.msra.mxu1 %v2419_v37  ;;  %v142_v37 = vadd.f32 %v2685_v36, %v2476_v50 }
 0xdae   :  { %1293 = vmatpush.msra.mxu1 %v2429_v39  ;;  %1432 = vmatpush.bf16.msra.mxu2 %v2104_v59 }
 0xdb0   :  { %1294 = vmatpush.msra.mxu1 %v2437_v40 }
 0xdd0   :  { %v906_v12 = vpop.permute.xlu0 %905 }
 0xdd1   :  { %931 = vst.msk [vmem:[#allocation3 + $0x20] sm:$0xff] %vm155_vm6, %v906_v12  ;;  %1975 = vmatmul.msk.f32.vlgmr.msrb.gmra.mxu3 %vm155_vm6, %v906_v12 }
 0xdd2   :  { %1223 = vmatpush.msrb.mxu3 %v2505_v54 }
 0xdd4   :  { %1224 = vmatpush.msrb.mxu3 %v2510_v55 }
 0xdd6   :  { %1225 = vmatpush.msrb.mxu3 %v2517_v57 }
 0xdd8   :  { %1226 = vmatpush.msrb.mxu3 %v2524_v58 }
 0xe26   :  { %v994_v39 = vpop.f32.mrf.mxu1 }
 0xe27   :  { %v1085_v40 = vadd.f32 %v994_v39, %v142_v37  ;;  %v1363_v37 = vld [vmem:[#allocation3 + $0x20] sm:$0xff] }
 0xe29   :  { %2211 = vtanh.f32 %v1085_v40  ;;  %v1981_v35 = vmul.f32 -1.442695, %v1085_v40  ;;  %v144_v40 = vadd.f32 %v2685_v36, %v2478_v51 }
 0xe2c   :  { %v1014_v54 = vpop.f32.mrf.mxu2 }
 0xe2f   :  { %v2212_v33 = vpop.eup %2211 }
 0xe30   :  { %1108 = vrot.lane.b32.xlu0 %v2212_v33, %s2280_s2 }
 0xe54   :  { %v926_v55 = vpop.f32.mrf.mxu3 }
 0xe55   :  { %v1015_v34 = vadd.f32 %v1014_v54, %v926_v55 }
 0xe57   :  { %v1017_v57 = vadd.f32 %v2484_v56, %v1015_v34 }
 0xe59   :  { %2213 = vtanh.f32 %v1017_v57  ;;  %v1979_v18 = vmul.f32 -1.442695, %v1017_v57 }
 0xe5a   :  { %2215 = vpow2.f32 %v1981_v35  ;;  %v2725_v35 = vld [vmem:[%s2905_s7] ss:$0 sm:$0xff] }
 0xe5f   :  { %v2214_v58 = vpop.eup %2213 }
 0xe60   :  { %1040 = vrot.lane.b32.xlu2 %v2214_v58, %s2280_s2  ;;  %v2216_v38 = vpop.eup %2215 }
 0xe61   :  { %v1089_v17 = vadd.f32 1.0, %v2216_v38 }
 0xe63   :  { %2217 = vrcp.f32 %v1089_v17  ;;  %v1101_v56 = vand.u32 2147483648, %v1089_v17  ;;  %vm1095_vm2 = vweird.f32 %v1089_v17  ;;  %v1099_v9 = vand.u32 2147483647, %v1089_v17 }
 0xe64   :  { %2219 = vpow2.f32 %v1979_v18 }
 0xe65   :  { %v1102_v24 = vor.u32 1.1754944e-38, %v1101_v56  ;;  %vm1100_vm4 = vcmp.eq.f32.partialorder %v1099_v9, 8.507059e+37 }
 0xe69   :  { %v2218_v50 = vpop.eup %2217 }
 0xe6a   :  { %v1091_v19 = vmul.f32 %v2218_v50, %v1089_v17  ;;  %v2220_v21 = vpop.eup %2219  ;;  %vm1096_vm1 = vweird.f32 %v2218_v50 }
 0xe6b   :  { %v1021_v48 = vadd.f32 1.0, %v2220_v21  ;;  %vm1097_vm3 = vmor %vm1095_vm2, %vm1096_vm1  ;;  %vm1520_vm2 = vcmask 130048  }
 0xe6c   :  { %v1092_v20 = vsub.f32 1.0, %v1091_v19 }
 0xe6d   :  { %2221 = vrcp.f32 %v1021_v48  ;;  %v1033_v44 = vand.u32 2147483648, %v1021_v48  ;;  %vm1027_vm7 = vweird.f32 %v1021_v48  ;;  %v1031_v45 = vand.u32 2147483647, %v1021_v48 }
 0xe6e   :  { %v1093_v22 = vmul.f32 %v2218_v50, %v1092_v20 }
 0xe6f   :  { %v1034_v30 = vor.u32 1.1754944e-38, %v1033_v44  ;;  %vm1032_vm9 = vcmp.eq.f32.partialorder %v1031_v45, 8.507059e+37 }
 0xe70   :  { %v1094_v23 = vadd.f32 %v2218_v50, %v1093_v22 }
 0xe72   :  { %v1098_v49 = vsel %vm1097_vm3, %v2218_v50, %v1094_v23 }
 0xe73   :  { %v1103_v26 = vsel %vm1100_vm4, %v1102_v24, %v1098_v49  ;;  %v2222_v28 = vpop.eup %2221 }
 0xe74   :  { %v1023_v29 = vmul.f32 %v2222_v28, %v1021_v48  ;;  %vm1028_vm5 = vweird.f32 %v2222_v28  ;;  %v1106_v62 = vmul.f32 %v1103_v26, %v2659_v10 }
 0xe75   :  { %vm1029_vm8 = vmor %vm1027_vm7, %vm1028_vm5  ;;  %vm1706_vm5 = vcmask 523264  }
 0xe76   :  { %v1024_v32 = vsub.f32 1.0, %v1023_v29 }
 0xe78   :  { %v1025_v41 = vmul.f32 %v2222_v28, %v1024_v32 }
 0xe7a   :  { %v1026_v42 = vadd.f32 %v2222_v28, %v1025_v41 }
 0xe7c   :  { %v1030_v52 = vsel %vm1029_vm8, %v2222_v28, %v1026_v42 }
 0xe7d   :  { %v1035_v60 = vsel %vm1032_vm9, %v1034_v30, %v1030_v52 }
 0xe7e   :  { %v1038_v2 = vmul.f32 %v1035_v60, %v2664_v14  ;;  %v1360_v14 = vld [vmem:[#allocation3 + $0x8] sm:$0xff] }
 0xe7f   :  { %v1375_v15 = vpack.c.bf16 %v1360_v14, %v1359_v3  ;;  %v2095_v3 = vld [vmem:[%s2899_s1] sm:$0xff] }
 0xea2   :  { %v1109_v25 = vpop.permute.xlu0 %1108 }
 0xea3   :  { %v1111_v27 = vmul.f32 %v1109_v25, %v1103_v26 }
 0xea5   :  { %1113 = vrot.lane.b32.xlu2 %v1111_v27, %s2281_s27 }
 0xeba   :  { %v1041_v53 = vpop.permute.xlu2 %1040 }
 0xebb   :  { %v1043_v61 = vmul.f32 %v1041_v53, %v1035_v60 }
 0xebd   :  { %1045 = vrot.lane.b32.xlu1 %v1043_v61, %s2281_s27 }
 0xeff   :  { %v1114_v0 = vpop.permute.xlu2 %1113 }
 0xf00   :  { %v2695_v1 = vadd.f32 %v1114_v0, %v1106_v62 }
 0xf02   :  { %2223 = vtanh.f32 %v2695_v1 }
 0xf08   :  { %v2224_v43 = vpop.eup %2223 }
 0xf09   :  { %1119 = vrot.lane.b32.xlu1 %v2224_v43, %s2280_s2 }
 0xf2f   :  { %v1046_v4 = vpop.permute.xlu1 %1045 }
 0xf30   :  { %v2700_v31 = vadd.f32 %v1046_v4, %v1038_v2 }
 0xf32   :  { %2225 = vtanh.f32 %v2700_v31 }
 0xf38   :  { %v2226_v5 = vpop.eup %2225 }
 0xf39   :  { %1051 = vrot.lane.b32.xlu0 %v2226_v5, %s2280_s2 }
 0xf7b   :  { %v1120_v7 = vpop.permute.xlu1 %1119 }
 0xf7c   :  { %v1122_v8 = vmul.f32 %v1120_v7, %v1103_v26 }
 0xf7e   :  { %1124 = vrot.lane.b32.xlu0 %v1122_v8, %s2281_s27 }
 0xfab   :  { %v1052_v63 = vpop.permute.xlu0 %1051 }
 0xfac   :  { %v1054_v10 = vmul.f32 %v1052_v63, %v1035_v60 }
 0xfae   :  { %1056 = vrot.lane.b32.xlu2 %v1054_v10, %s2281_s27 }
 0xff0   :  { %v1125_v13 = vpop.permute.xlu0 %1124 }
 0xff1   :  { %1982 = vmatmul.msk.f32.vlgmr.msrb.gmra.mxu1 %vm155_vm6, %v1125_v13  ;;  %1983 = vmatmul.msk.f32.vlgmr.msrb.gmra.mxu2 %vm155_vm6, %v1125_v13 }
 0xff9   :  { %1997 = vmatmul.msk.bf16.vlgmr.msra.gmra.mxu2 %vm155_vm6, %v1375_v15  ;;  %v2096_v15 = vld [vmem:[%s2899_s1 + $0x8] sm:$0xff] }
0x1008   :  { %v1057_v6 = vpop.permute.xlu2 %1056 }
0x1009   :  { %1082 = vst.msk [vmem:[#allocation3 + $0x28] sm:$0xff] %vm155_vm6, %v1057_v6  ;;  %1980 = vmatmul.msk.f32.vlgmr.msra.gmra.mxu3 %vm155_vm6, %v1057_v6  ;;  %1998 = vmatmul.msk.bf16.gmra.mxu2 %vm155_vm6, %v1376_v47  ;;  %v2108_v47 = vld [vmem:[%s2909_s11 + $0x10] sm:$0xff]  ;;  %v2107_v6 = vld [vmem:[%s2909_s11 + $0x8] sm:$0xff] }
0x100a   :  { %1736 = vmatpush.bf16.msrb.mxu0 %v2108_v47 }
0x100e   :  { %1737 = vmatpush.bf16.msrb.mxu0 %v2107_v6 }
0x1010   :  { %v1364_v12 = vld [vmem:[#allocation3 + $0x28] sm:$0xff] }
0x1011   :  { %v1377_v39 = vpack.c.bf16 %v1364_v12, %v1363_v37  ;;  %v2106_v12 = vld [vmem:[%s2909_s11] sm:$0xff] }
0x1012   :  { %1738 = vmatpush.bf16.msrb.mxu0 %v2106_v12 }
0x1019   :  { %1999 = vmatmul.msk.bf16.gmra.mxu2 %vm155_vm6, %v1377_v39 }
0x106e   :  { %v1145_v33 = vpop.f32.mrf.mxu1 }
0x106f   :  { %v1236_v54 = vadd.f32 %v1145_v33, %v144_v40 }
0x1071   :  { %2227 = vtanh.f32 %v1236_v54  ;;  %v1986_v51 = vmul.f32 -1.442695, %v1236_v54 }
0x1074   :  { %v1165_v34 = vpop.f32.mrf.mxu2 }
0x1077   :  { %v2228_v55 = vpop.eup %2227 }
0x1078   :  { %1259 = vrot.lane.b32.xlu2 %v2228_v55, %s2280_s2 }
0x107c   :  { %v1434_v37 = vpop.f32.mrf.mxu2 }
0x1084   :  { %v1436_v55 = vpop.f32.mrf.mxu2 }
0x108c   :  { %v1077_v57 = vpop.f32.mrf.mxu3 }
0x108d   :  { %v1166_v58 = vadd.f32 %v1165_v34, %v1077_v57 }
0x108f   :  { %v1168_v38 = vadd.f32 %v2725_v35, %v1166_v58 }
0x1091   :  { %2229 = vtanh.f32 %v1168_v38  ;;  %v1984_v26 = vmul.f32 -1.442695, %v1168_v38  ;;  %v2774_v38 = vld [vmem:[%s2908_s10] ss:$0 sm:$0xff] }
0x1092   :  { %2231 = vpow2.f32 %v1986_v51 }
0x1097   :  { %v2230_v17 = vpop.eup %2229 }
0x1098   :  { %1191 = vrot.lane.b32.xlu1 %v2230_v17, %s2280_s2  ;;  %v2232_v36 = vpop.eup %2231 }
0x1099   :  { %v1240_v50 = vadd.f32 1.0, %v2232_v36 }
0x109b   :  { %2233 = vrcp.f32 %v1240_v50  ;;  %v1252_v48 = vand.u32 2147483648, %v1240_v50  ;;  %vm1246_vm11 = vweird.f32 %v1240_v50  ;;  %v1250_v23 = vand.u32 2147483647, %v1240_v50 }
0x109c   :  { %2235 = vpow2.f32 %v1984_v26 }
0x109d   :  { %v1253_v9 = vor.u32 1.1754944e-38, %v1252_v48  ;;  %vm1251_vm13 = vcmp.eq.f32.partialorder %v1250_v23, 8.507059e+37 }
0x10a1   :  { %v2234_v18 = vpop.eup %2233 }
0x10a2   :  { %v1242_v19 = vmul.f32 %v2234_v18, %v1240_v50  ;;  %vm1247_vm10 = vweird.f32 %v2234_v18  ;;  %v2236_v27 = vpop.eup %2235  ;;  %v1439_v50 = vpop.f32.mrf.mxu2 }
0x10a3   :  { %vm1248_vm12 = vmor %vm1246_vm11, %vm1247_vm10  ;;  %v1172_v28 = vadd.f32 1.0, %v2236_v27 }
0x10a4   :  { %v1243_v20 = vsub.f32 1.0, %v1242_v19 }
0x10a5   :  { %2237 = vrcp.f32 %v1172_v28  ;;  %v1184_v45 = vand.u32 2147483648, %v1172_v28  ;;  %vm1178_vm15 = vweird.f32 %v1172_v28  ;;  %v1182_v52 = vand.u32 2147483647, %v1172_v28 }
0x10a6   :  { %v1244_v21 = vmul.f32 %v2234_v18, %v1243_v20 }
0x10a7   :  { %v1185_v53 = vor.u32 1.1754944e-38, %v1184_v45  ;;  %vm1183_vm1 = vcmp.eq.f32.partialorder %v1182_v52, 8.507059e+37 }
0x10a8   :  { %v1245_v22 = vadd.f32 %v2234_v18, %v1244_v21 }
0x10aa   :  { %v1249_v56 = vsel %vm1248_vm12, %v2234_v18, %v1245_v22 }
0x10ab   :  { %v1254_v24 = vsel %vm1251_vm13, %v1253_v9, %v1249_v56  ;;  %v2238_v29 = vpop.eup %2237  ;;  %v1441_v56 = vpop.f32.mrf.mxu2 }
0x10ac   :  { %v1174_v32 = vmul.f32 %v2238_v29, %v1172_v28  ;;  %vm1179_vm14 = vweird.f32 %v2238_v29  ;;  %v1257_v0 = vmul.f32 %v1254_v24, %v2695_v1 }
0x10ad   :  { %vm1180_vm0 = vmor %vm1178_vm15, %vm1179_vm14 }
0x10ae   :  { %v1175_v41 = vsub.f32 1.0, %v1174_v32 }
0x10b0   :  { %v1176_v42 = vmul.f32 %v2238_v29, %v1175_v41 }
0x10b2   :  { %v1177_v44 = vadd.f32 %v2238_v29, %v1176_v42 }
0x10b3   :  { %v1444_v28 = vpop.f32.mrf.mxu2 }
0x10b4   :  { %v1181_v30 = vsel %vm1180_vm0, %v2238_v29, %v1177_v44 }
0x10b5   :  { %v1186_v61 = vsel %vm1183_vm1, %v1185_v53, %v1181_v30 }
0x10b6   :  { %v1189_v5 = vmul.f32 %v1186_v61, %v2700_v31  ;;  %v2103_v31 = vld [vmem:[%s2906_s8] sm:$0xff] }
0x10b7   :  { %1552 = vmatpush.bf16.msra.mxu3 %v2103_v31 }
0x10bb   :  { %v1446_v52 = vpop.f32.mrf.mxu2 }
0x10d2   :  { %v1260_v49 = vpop.permute.xlu2 %1259 }
0x10d3   :  { %v1262_v25 = vmul.f32 %v1260_v49, %v1254_v24 }
0x10d5   :  { %1264 = vrot.lane.b32.xlu1 %v1262_v25, %s2281_s27 }
0x110a   :  { %v1192_v60 = vpop.permute.xlu1 %1191 }
0x110b   :  { %v1194_v62 = vmul.f32 %v1192_v60, %v1186_v61 }
0x110d   :  { %1196 = vrot.lane.b32.xlu0 %v1194_v62, %s2281_s27 }
0x1147   :  { %v1265_v43 = vpop.permute.xlu1 %1264 }
0x1148   :  { %v1267_v2 = vadd.f32 %v1265_v43, %v1257_v0 }
0x114a   :  { %2239 = vtanh.f32 %v1267_v2 }
0x1150   :  { %v2240_v4 = vpop.eup %2239 }
0x1151   :  { %1270 = vrot.lane.b32.xlu0 %v2240_v4, %s2280_s2 }
0x117f   :  { %v1197_v7 = vpop.permute.xlu0 %1196 }
0x1180   :  { %v2734_v8 = vadd.f32 %v1197_v7, %v1189_v5 }
0x1182   :  { %2241 = vtanh.f32 %v2734_v8 }
0x1188   :  { %v2242_v63 = vpop.eup %2241 }
0x1189   :  { %1202 = vrot.lane.b32.xlu2 %v2242_v63, %s2280_s2 }
0x11c3   :  { %v1271_v10 = vpop.permute.xlu0 %1270 }
0x11c4   :  { %v1273_v11 = vmul.f32 %v1271_v10, %v1254_v24 }
0x11c6   :  { %1275 = vrot.lane.b32.xlu2 %v1273_v11, %s2281_s27 }
0x11e3   :  { %v1203_v1 = vpop.permute.xlu2 %1202 }
0x11e4   :  { %v1205_v59 = vmul.f32 %v1203_v1, %v1186_v61 }
0x11e6   :  { %1207 = vrot.lane.b32.xlu1 %v1205_v59, %s2281_s27 }
0x1220   :  { %v1276_v13 = vpop.permute.xlu2 %1275 }
0x1221   :  { %1987 = vmatmul.msk.f32.vlgmr.msra.gmra.mxu1 %vm155_vm6, %v1276_v13 }
0x1258   :  { %v1208_v14 = vpop.permute.xlu1 %1207 }
0x1259   :  { %1233 = vst.msk [vmem:[#allocation3 + $0x30] sm:$0xff] %vm155_vm6, %v1208_v14  ;;  %1985 = vmatmul.msk.f32.vlgmr.msrb.gmra.mxu3 %vm155_vm6, %v1208_v14 }
0x1261   :  { %2041 = vmatmul.msk.bf16.vlgmr.msra.gmra.mxu3 %vm1520_vm2, %v2095_v3 }
0x1271   :  { %2042 = vmatmul.msk.bf16.gmra.mxu3 %vm1520_vm2, %v2096_v15 }
0x1281   :  { %2043 = vmatmul.msk.bf16.gmra.mxu3 %vm1520_vm2, %v2097_v46 }
0x129e   :  { %v1296_v39 = vpop.f32.mrf.mxu1 }
0x12dc   :  { %v1228_v40 = vpop.f32.mrf.mxu3 }
0x12dd   :  { %v1297_v33 = vadd.f32 %v1296_v39, %v1228_v40 }
0x12df   :  { %v1299_v54 = vadd.f32 %v2725_v35, %v1297_v33  ;;  %v2098_v33 = vld [vmem:[%s2899_s1 + $0x18] sm:$0xff] }
0x12e0   :  { %2044 = vmatmul.msk.bf16.gmra.mxu3 %vm1520_vm2, %v2098_v33 }
0x12e1   :  { %2243 = vtanh.f32 %v1299_v54  ;;  %v1988_v4 = vmul.f32 -1.442695, %v1299_v54  ;;  %v2282_v54 = vmov 0.0  }
0x12e2   :  { %156 = vst.msk [vmem:[#allocation3 + $0x40] sm:$0xff] %vm155_vm6, %v2282_v54 }
0x12e3   :  { %2245 = vpow2.f32 %v1988_v4  ;;  %157 = vst.msk [vmem:[#allocation3 + $0x48] sm:$0xff] %vm155_vm6, %v2282_v54 }
0x12e4   :  { %v1554_v34 = vpop.f32.mrf.mxu3  ;;  %158 = vst.msk [vmem:[#allocation3 + $0x50] sm:$0xff] %vm155_vm6, %v2282_v54 }
0x12e5   :  { %v1555_v58 = vadd.f32 %v1554_v34, %v1434_v37  ;;  %159 = vst.msk [vmem:[#allocation3 + $0x58] sm:$0xff] %vm155_vm6, %v2282_v54 }
0x12e6   :  { %160 = vst.msk [vmem:[#allocation3 + $0x60] sm:$0xff] %vm155_vm6, %v2282_v54 }
0x12e7   :  { %v2244_v57 = vpop.eup %2243  ;;  %v1598_v17 = vadd.f32 %v2774_v38, %v1555_v58  ;;  %161 = vst.msk [vmem:[#allocation3 + $0x68] sm:$0xff] %vm155_vm6, %v2282_v54 }
0x12e8   :  { %1322 = vrot.lane.b32.xlu0 %v2244_v57, %s2280_s2  ;;  %162 = vst.msk [vmem:[#allocation3 + $0x70] sm:$0xff] %vm155_vm6, %v2282_v54  ;;  %v1365_v57 = vld [vmem:[#allocation3 + $0x30] sm:$0xff] }
0x12e9   :  { %v1630_v18 = vmul.f32 0.01, %v1598_v17  ;;  %vm1614_vm3 = vcmp.ge.f32.partialorder %v1598_v17, 0.0  ;;  %v2246_v5 = vpop.eup %2245  ;;  %163 = vst.msk [vmem:[#allocation3 + $0x78] sm:$0xff] %vm155_vm6, %v2282_v54 }
0x12ea   :  { %v1303_v7 = vadd.f32 1.0, %v2246_v5 }
0x12eb   :  { %v1646_v20 = vsel %vm1614_vm3, %v1598_v17, %v1630_v18 }
0x12ec   :  { %v1556_v51 = vpop.f32.mrf.mxu3  ;;  %2247 = vrcp.f32 %v1303_v7  ;;  %v1315_v13 = vand.u32 2147483648, %v1303_v7  ;;  %vm1309_vm12 = vweird.f32 %v1303_v7  ;;  %v1313_v31 = vand.u32 2147483647, %v1303_v7 }
0x12ed   :  { %v1557_v36 = vadd.f32 %v1556_v51, %v1436_v55  ;;  %v2100_v55 = vld [vmem:[%s2899_s1 + $0x28] sm:$0xff]  ;;  %v2101_v51 = vld [vmem:[%s2899_s1 + $0x30] sm:$0xff] }
0x12ee   :  { %v1316_v3 = vor.u32 1.1754944e-38, %v1315_v13  ;;  %vm1314_vm14 = vcmp.eq.f32.partialorder %v1313_v31, 8.507059e+37 }
0x12ef   :  { %v1599_v35 = vadd.f32 %v2774_v38, %v1557_v36  ;;  %v1367_v36 = vld [vmem:[#allocation3 + $0x40] sm:$0xff] }
0x12f1   :  { %vm1615_vm4 = vcmp.ge.f32.partialorder %v1599_v35, 0.0  ;;  %v1631_v19 = vmul.f32 0.01, %v1599_v35 }
0x12f2   :  { %v2248_v63 = vpop.eup %2247 }
0x12f3   :  { %v1647_v21 = vsel %vm1615_vm4, %v1599_v35, %v1631_v19  ;;  %v1305_v10 = vmul.f32 %v2248_v63, %v1303_v7  ;;  %vm1310_vm11 = vweird.f32 %v2248_v63  ;;  %v2102_v35 = vld [vmem:[%s2899_s1 + $0x38] sm:$0xff]  ;;  %v1369_v19 = vld [vmem:[#allocation3 + $0x50] sm:$0xff] }
0x12f4   :  { %v1662_v22 = vpack.c.bf16 %v1647_v21, %v1646_v20  ;;  %v1559_v48 = vpop.f32.mrf.mxu3  ;;  %vm1311_vm13 = vmor %vm1309_vm12, %vm1310_vm11  ;;  %v1370_v20 = vld [vmem:[#allocation3 + $0x58] sm:$0xff] }
0x12f5   :  { %v1560_v23 = vadd.f32 %v1559_v48, %v1439_v50  ;;  %v1306_v11 = vsub.f32 1.0, %v1305_v10  ;;  %v1368_v50 = vld [vmem:[#allocation3 + $0x48] sm:$0xff]  ;;  %v1380_v21 = vpack.c.bf16 %v1370_v20, %v1369_v19 }
0x12f6   :  { %2065 = vmatmul.msk.bf16.vlgmr.msrb.gmra.mxu0 %vm1706_vm5, %v1662_v22  ;;  %v1379_v18 = vpack.c.bf16 %v1368_v50, %v1367_v36  ;;  %v1371_v22 = vld [vmem:[#allocation3 + $0x60] sm:$0xff]  ;;  %v1372_v48 = vld [vmem:[#allocation3 + $0x68] sm:$0xff] }
0x12f7   :  { %v1600_v9 = vadd.f32 %v2774_v38, %v1560_v23  ;;  %v1307_v1 = vmul.f32 %v2248_v63, %v1306_v11  ;;  %v1381_v23 = vpack.c.bf16 %v1372_v48, %v1371_v22 }
0x12f9   :  { %v1632_v25 = vmul.f32 0.01, %v1600_v9  ;;  %vm1616_vm7 = vcmp.ge.f32.partialorder %v1600_v9, 0.0  ;;  %v1308_v59 = vadd.f32 %v2248_v63, %v1307_v1 }
0x12fb   :  { %v1648_v29 = vsel %vm1616_vm7, %v1600_v9, %v1632_v25  ;;  %v1312_v14 = vsel %vm1311_vm13, %v2248_v63, %v1308_v59  ;;  %v1374_v9 = vld [vmem:[#allocation3 + $0x78] sm:$0xff] }
0x12fc   :  { %v1561_v49 = vpop.f32.mrf.mxu3  ;;  %v1317_v46 = vsel %vm1314_vm14, %v1316_v3, %v1312_v14 }
0x12fd   :  { %v1562_v24 = vadd.f32 %v1561_v49, %v1441_v56  ;;  %v1320_v47 = vmul.f32 %v1317_v46, %v2734_v8  ;;  %v2099_v8 = vld [vmem:[%s2899_s1 + $0x20] sm:$0xff]  ;;  %v1373_v56 = vld [vmem:[#allocation3 + $0x70] sm:$0xff] }
0x12fe   :  { %2045 = vmatmul.msk.bf16.gmra.mxu3 %vm1520_vm2, %v2099_v8  ;;  %v1382_v49 = vpack.c.bf16 %v1374_v9, %v1373_v56 }
0x12ff   :  { %v1601_v26 = vadd.f32 %v2774_v38, %v1562_v24 }
0x1301   :  { %vm1617_vm8 = vcmp.ge.f32.partialorder %v1601_v26, 0.0  ;;  %v1633_v27 = vmul.f32 0.01, %v1601_v26 }
0x1303   :  { %v1649_v32 = vsel %vm1617_vm8, %v1601_v26, %v1633_v27 }
0x1304   :  { %v1564_v41 = vpop.f32.mrf.mxu3  ;;  %v1663_v42 = vpack.c.bf16 %v1649_v32, %v1648_v29 }
0x1305   :  { %v1565_v44 = vadd.f32 %v1564_v41, %v1444_v28 }
0x1306   :  { %2066 = vmatmul.msk.bf16.gmra.mxu0 %vm1706_vm5, %v1663_v42 }
0x1307   :  { %v1602_v45 = vadd.f32 %v2774_v38, %v1565_v44 }
0x1309   :  { %v1634_v60 = vmul.f32 0.01, %v1602_v45  ;;  %vm1618_vm9 = vcmp.ge.f32.partialorder %v1602_v45, 0.0 }
0x130b   :  { %v1650_v0 = vsel %vm1618_vm9, %v1602_v45, %v1634_v60 }
0x130c   :  { %v1566_v30 = vpop.f32.mrf.mxu3 }
0x130d   :  { %v1567_v53 = vadd.f32 %v1566_v30, %v1446_v52 }
0x130e   :  { %2046 = vmatmul.msk.bf16.gmra.mxu3 %vm1520_vm2, %v2100_v55 }
0x130f   :  { %v1603_v61 = vadd.f32 %v2774_v38, %v1567_v53 }
0x1311   :  { %vm1619_vm10 = vcmp.ge.f32.partialorder %v1603_v61, 0.0  ;;  %v1635_v62 = vmul.f32 0.01, %v1603_v61 }
0x1313   :  { %v1651_v43 = vsel %vm1619_vm10, %v1603_v61, %v1635_v62 }
0x1314   :  { %v1664_v2 = vpack.c.bf16 %v1651_v43, %v1650_v0 }
0x1316   :  { %2067 = vmatmul.msk.bf16.gmra.mxu0 %vm1706_vm5, %v1664_v2 }
0x131e   :  { %2047 = vmatmul.msk.bf16.gmra.mxu3 %vm1520_vm2, %v2101_v51 }
0x132e   :  { %2048 = vmatmul.msk.bf16.gmra.mxu3 %vm1520_vm2, %v2102_v35 }
0x135a   :  { %v1323_v15 = vpop.permute.xlu0 %1322 }
0x135b   :  { %v1325_v16 = vmul.f32 %v1323_v15, %v1317_v46 }
0x135d   :  { %1327 = vrot.lane.b32.xlu1 %v1325_v16, %s2281_s27 }
0x1363   :  { %v1569_v24 = vpop.f32.mrf.mxu3 }
0x136b   :  { %v1571_v25 = vpop.f32.mrf.mxu3 }
0x1381   :  { %v1574_v27 = vpop.f32.mrf.mxu3 }
0x1389   :  { %v1576_v45 = vpop.f32.mrf.mxu3 }
0x1391   :  { %v1579_v0 = vpop.f32.mrf.mxu3 }
0x1399   :  { %v1581_v59 = vpop.f32.mrf.mxu3 }
0x13cf   :  { %v1328_v6 = vpop.permute.xlu1 %1327 }
0x13d0   :  { %v1330_v12 = vadd.f32 %v1328_v6, %v1320_v47 }
0x13d2   :  { %2249 = vtanh.f32 %v1330_v12 }
0x13d8   :  { %v2250_v37 = vpop.eup %2249 }
0x13d9   :  { %1333 = vrot.lane.b32.xlu2 %v2250_v37, %s2280_s2 }
0x1433   :  { %v1334_v39 = vpop.permute.xlu2 %1333 }
0x1434   :  { %v1336_v40 = vmul.f32 %v1334_v39, %v1317_v46  ;;  %v1584_v46 = vpop.f32.mrf.mxu3 }
0x1436   :  { %1338 = vrot.lane.b32.xlu0 %v1336_v40, %s2281_s27 }
0x143c   :  { %v1586_v54 = vpop.f32.mrf.mxu3 }
0x1444   :  { %v1589_v51 = vpop.f32.mrf.mxu3 }
0x14a8   :  { %v1339_v34 = vpop.permute.xlu0 %1338 }
0x14a9   :  { %1342 = vst.msk [vmem:[#allocation3 + $0x38] sm:$0xff] %vm155_vm6, %v1339_v34 }
0x14b0   :  { %v1366_v58 = vld [vmem:[#allocation3 + $0x38] sm:$0xff] }
0x14b1   :  { %v1378_v17 = vpack.c.bf16 %v1366_v58, %v1365_v57 }
0x14b3   :  { %2000 = vmatmul.msk.bf16.gmra.mxu2 %vm155_vm6, %v1378_v17 }
0x14c3   :  { %2001 = vmatmul.msk.bf16.gmra.mxu2 %vm155_vm6, %v1379_v18 }
0x14d3   :  { %2002 = vmatmul.msk.bf16.gmra.mxu2 %vm155_vm6, %v1380_v21  ;;  %v1591_v21 = vpop.f32.mrf.mxu3 }
0x14e3   :  { %2003 = vmatmul.msk.bf16.gmra.mxu2 %vm155_vm6, %v1381_v23 }
0x14f3   :  { %2004 = vmatmul.msk.bf16.gmra.mxu2 %vm155_vm6, %v1382_v49 }
0x1536   :  { %v1449_v26 = vpop.f32.mrf.mxu2 }
0x1537   :  { %v1570_v28 = vadd.f32 %v1569_v24, %v1449_v26  ;;  %v2839_v26 = vpop.f32.mrf.mxu0 }
0x1539   :  { %v1604_v29 = vadd.f32 %v2774_v38, %v1570_v28 }
0x153b   :  { %v1636_v42 = vmul.f32 0.01, %v1604_v29  ;;  %vm1620_vm15 = vcmp.ge.f32.partialorder %v1604_v29, 0.0 }
0x153d   :  { %v1652_v30 = vsel %vm1620_vm15, %v1604_v29, %v1636_v42 }
0x153e   :  { %v1451_v32 = vpop.f32.mrf.mxu2 }
0x153f   :  { %v1572_v41 = vadd.f32 %v1571_v25, %v1451_v32 }
0x1541   :  { %v1605_v44 = vadd.f32 %v2774_v38, %v1572_v41 }
0x1543   :  { %vm1621_vm0 = vcmp.ge.f32.partialorder %v1605_v44, 0.0  ;;  %v1637_v52 = vmul.f32 0.01, %v1605_v44 }
0x1545   :  { %v1653_v53 = vsel %vm1621_vm0, %v1605_v44, %v1637_v52 }
0x1546   :  { %v1454_v60 = vpop.f32.mrf.mxu2  ;;  %v1665_v61 = vpack.c.bf16 %v1653_v53, %v1652_v30 }
0x1547   :  { %v1575_v62 = vadd.f32 %v1574_v27, %v1454_v60  ;;  %v2841_v27 = vpop.f32.mrf.mxu0 }
0x1548   :  { %2068 = vmatmul.msk.bf16.gmra.mxu0 %vm1706_vm5, %v1665_v61 }
0x1549   :  { %v1606_v43 = vadd.f32 %v2774_v38, %v1575_v62  ;;  %v2852_v62 = vld [vmem:[%s2910_s12] ss:$0 sm:$0xff] }
0x154b   :  { %v1638_v5 = vmul.f32 0.01, %v1606_v43  ;;  %vm1622_vm6 = vcmp.ge.f32.partialorder %v1606_v43, 0.0 }
0x154d   :  { %v1654_v10 = vsel %vm1622_vm6, %v1606_v43, %v1638_v5 }
0x154e   :  { %v1456_v2 = vpop.f32.mrf.mxu2 }
0x154f   :  { %v1577_v4 = vadd.f32 %v1576_v45, %v1456_v2  ;;  %v2843_v28 = vpop.f32.mrf.mxu0 }
0x1551   :  { %v1607_v7 = vadd.f32 %v2774_v38, %v1577_v4 }
0x1553   :  { %vm1623_vm1 = vcmp.ge.f32.partialorder %v1607_v7, 0.0  ;;  %v1639_v63 = vmul.f32 0.01, %v1607_v7 }
0x1555   :  { %v1655_v11 = vsel %vm1623_vm1, %v1607_v7, %v1639_v63 }
0x1556   :  { %v1459_v1 = vpop.f32.mrf.mxu2  ;;  %v1666_v13 = vpack.c.bf16 %v1655_v11, %v1654_v10 }
0x1557   :  { %v1580_v31 = vadd.f32 %v1579_v0, %v1459_v1  ;;  %v2845_v29 = vpop.f32.mrf.mxu0 }
0x1558   :  { %2069 = vmatmul.msk.bf16.gmra.mxu0 %vm1706_vm5, %v1666_v13 }
0x1559   :  { %v1608_v14 = vadd.f32 %v2774_v38, %v1580_v31 }
0x155b   :  { %v1640_v16 = vmul.f32 0.01, %v1608_v14  ;;  %vm1624_vm3 = vcmp.ge.f32.partialorder %v1608_v14, 0.0 }
0x155d   :  { %v1656_v12 = vsel %vm1624_vm3, %v1608_v14, %v1640_v16 }
0x155e   :  { %v1461_v3 = vpop.f32.mrf.mxu2 }
0x155f   :  { %v1582_v15 = vadd.f32 %v1581_v59, %v1461_v3  ;;  %v2847_v32 = vpop.f32.mrf.mxu0 }
0x1561   :  { %v1609_v47 = vadd.f32 %v2774_v38, %v1582_v15 }
0x1563   :  { %vm1625_vm4 = vcmp.ge.f32.partialorder %v1609_v47, 0.0  ;;  %v1641_v6 = vmul.f32 0.01, %v1609_v47 }
0x1565   :  { %v1657_v37 = vsel %vm1625_vm4, %v1609_v47, %v1641_v6 }
0x1566   :  { %v1464_v39 = vpop.f32.mrf.mxu2  ;;  %v1667_v40 = vpack.c.bf16 %v1657_v37, %v1656_v12 }
0x1567   :  { %v1585_v33 = vadd.f32 %v1584_v46, %v1464_v39  ;;  %v1752_v41 = vpop.f32.mrf.mxu0 }
0x1568   :  { %2070 = vmatmul.msk.bf16.gmra.mxu0 %vm1706_vm5, %v1667_v40 }
0x1569   :  { %v1610_v8 = vadd.f32 %v2774_v38, %v1585_v33 }
0x156b   :  { %v1642_v57 = vmul.f32 0.01, %v1610_v8  ;;  %vm1626_vm7 = vcmp.ge.f32.partialorder %v1610_v8, 0.0 }
0x156d   :  { %v1658_v36 = vsel %vm1626_vm7, %v1610_v8, %v1642_v57 }
0x156e   :  { %v1466_v55 = vpop.f32.mrf.mxu2 }
0x156f   :  { %v1587_v34 = vadd.f32 %v1586_v54, %v1466_v55 }
0x1571   :  { %v1611_v58 = vadd.f32 %v2774_v38, %v1587_v34  ;;  %v1753_v34 = vadd.f32 %v2852_v62, %v1752_v41 }
0x1573   :  { %vm1627_vm8 = vcmp.ge.f32.partialorder %v1611_v58, 0.0  ;;  %v1643_v17 = vmul.f32 0.01, %v1611_v58  ;;  %vm1785_vm4 = vcmp.ge.f32.partialorder %v1753_v34, 0.0 }
0x1575   :  { %v1659_v50 = vsel %vm1627_vm8, %v1611_v58, %v1643_v17  ;;  %v1829_v17 = vld [vmem:[#allocation4] sm:$0x1] }
0x1576   :  { %v1469_v18 = vpop.f32.mrf.mxu2  ;;  %v1668_v35 = vpack.c.bf16 %v1659_v50, %v1658_v36  ;;  %1832 = vperm.xlu1 %2117, %v1829_v17   ;;  %v1801_v36 = vmul.f32 0.01, %v1753_v34 }
0x1577   :  { %v1590_v19 = vadd.f32 %v1589_v51, %v1469_v18  ;;  %v1751_v51 = vadd.f32 %v2852_v62, %v2847_v32  ;;  %v1748_v18 = vadd.f32 %v2852_v62, %v2845_v29 }
0x1578   :  { %2071 = vmatmul.msk.bf16.gmra.mxu0 %vm1706_vm5, %v1668_v35 }
0x1579   :  { %v1612_v20 = vadd.f32 %v2774_v38, %v1590_v19  ;;  %v1800_v35 = vmul.f32 0.01, %v1751_v51  ;;  %v1817_v19 = vsel %vm1785_vm4, %v1753_v34, %v1801_v36  ;;  %vm1784_vm7 = vcmp.ge.f32.partialorder %v1751_v51, 0.0 }
0x157a   :  { %vm1783_vm8 = vcmp.ge.f32.partialorder %v1748_v18, 0.0 }
0x157b   :  { %v1644_v23 = vmul.f32 0.01, %v1612_v20  ;;  %vm1628_vm9 = vcmp.ge.f32.partialorder %v1612_v20, 0.0 }
0x157d   :  { %v1660_v49 = vsel %vm1628_vm9, %v1612_v20, %v1644_v23  ;;  %v1746_v20 = vadd.f32 %v2852_v62, %v2843_v28 }
0x157e   :  { %v1471_v22 = vpop.f32.mrf.mxu2 }
0x157f   :  { %v1592_v48 = vadd.f32 %v1591_v21, %v1471_v22  ;;  %v1799_v21 = vmul.f32 0.01, %v1748_v18  ;;  %v1816_v22 = vsel %vm1784_vm7, %v1751_v51, %v1800_v35  ;;  %v1798_v23 = vmul.f32 0.01, %v1746_v20 }
0x1580   :  { %vm1782_vm9 = vcmp.ge.f32.partialorder %v1746_v20, 0.0 }
0x1581   :  { %v1613_v56 = vadd.f32 %v2774_v38, %v1592_v48  ;;  %v1743_v48 = vadd.f32 %v2852_v62, %v2841_v27  ;;  %v1828_v27 = vld [vmem:[%s2911_s13] sm:$0x1] }
0x1583   :  { %vm1629_vm10 = vcmp.ge.f32.partialorder %v1613_v56, 0.0  ;;  %v1645_v9 = vmul.f32 0.01, %v1613_v56 }
0x1585   :  { %v1661_v24 = vsel %vm1629_vm10, %v1613_v56, %v1645_v9  ;;  %v1815_v56 = vsel %vm1783_vm8, %v1748_v18, %v1799_v21  ;;  %v1741_v9 = vadd.f32 %v2852_v62, %v2839_v26  ;;  %vm1781_vm10 = vcmp.ge.f32.partialorder %v1743_v48, 0.0 }
0x1586   :  { %v1669_v25 = vpack.c.bf16 %v1661_v24, %v1660_v49  ;;  %v1797_v49 = vmul.f32 0.01, %v1743_v48  ;;  %v1814_v24 = vsel %vm1782_vm9, %v1746_v20, %v1798_v23 }
0x1588   :  { %2072 = vmatmul.msk.bf16.gmra.mxu0 %vm1706_vm5, %v1669_v25  ;;  %v1796_v25 = vmul.f32 0.01, %v1741_v9  ;;  %v1813_v28 = vsel %vm1781_vm10, %v1743_v48, %v1797_v49 }
0x15c5   :  { %v1755_v38 = vpop.f32.mrf.mxu0 }
0x15c6   :  { %v1756_v54 = vadd.f32 %v2852_v62, %v1755_v38 }
0x15c8   :  { %v1802_v57 = vmul.f32 0.01, %v1756_v54  ;;  %vm1786_vm3 = vcmp.ge.f32.partialorder %v1756_v54, 0.0 }
0x15ca   :  { %v1818_v50 = vsel %vm1786_vm3, %v1756_v54, %v1802_v57 }
0x15cd   :  { %v1757_v42 = vpop.f32.mrf.mxu0 }
0x15ce   :  { %v1758_v39 = vadd.f32 %v2852_v62, %v1757_v42 }
0x15d0   :  { %v1803_v8 = vmul.f32 0.01, %v1758_v39  ;;  %vm1787_vm1 = vcmp.ge.f32.partialorder %v1758_v39, 0.0 }
0x15d2   :  { %v1819_v58 = vsel %vm1787_vm1, %v1758_v39, %v1803_v8 }
0x15d5   :  { %v1760_v44 = vpop.f32.mrf.mxu0 }
0x15d6   :  { %v1761_v6 = vadd.f32 %v2852_v62, %v1760_v44 }
0x15d8   :  { %v1804_v40 = vmul.f32 0.01, %v1761_v6  ;;  %vm1788_vm6 = vcmp.ge.f32.partialorder %v1761_v6, 0.0 }
0x15da   :  { %v1820_v55 = vsel %vm1788_vm6, %v1761_v6, %v1804_v40 }
0x15dd   :  { %v1762_v45 = vpop.f32.mrf.mxu0 }
0x15de   :  { %v1763_v46 = vadd.f32 %v2852_v62, %v1762_v45 }
0x15e0   :  { %v1805_v12 = vmul.f32 0.01, %v1763_v46  ;;  %vm1789_vm0 = vcmp.ge.f32.partialorder %v1763_v46, 0.0 }
0x15e2   :  { %v1821_v33 = vsel %vm1789_vm0, %v1763_v46, %v1805_v12 }
0x15e5   :  { %v1765_v52 = vpop.f32.mrf.mxu0 }
0x15e6   :  { %v1766_v14 = vadd.f32 %v2852_v62, %v1765_v52 }
0x15e8   :  { %v1806_v16 = vmul.f32 0.01, %v1766_v14  ;;  %vm1790_vm15 = vcmp.ge.f32.partialorder %v1766_v14, 0.0  ;;  %v1833_v26 = vpop.permute.xlu1 %1832 }
0x15e9   :  { %v1835_v32 = vperm.slane %v1833_v26, 0 }
0x15ea   :  { %v1822_v37 = vsel %vm1790_vm15, %v1766_v14, %v1806_v16 }
0x15ed   :  { %v1767_v30 = vpop.f32.mrf.mxu0 }
0x15ee   :  { %v1768_v59 = vadd.f32 %v2852_v62, %v1767_v30 }
0x15f0   :  { %v1807_v3 = vmul.f32 0.01, %v1768_v59  ;;  %vm1791_vm14 = vcmp.ge.f32.partialorder %v1768_v59, 0.0 }
0x15f2   :  { %v1823_v47 = vsel %vm1791_vm14, %v1768_v59, %v1807_v3 }
0x15f5   :  { %v1770_v53 = vpop.f32.mrf.mxu0 }
0x15f6   :  { %v1771_v10 = vadd.f32 %v2852_v62, %v1770_v53 }
0x15f8   :  { %v1808_v13 = vmul.f32 0.01, %v1771_v10  ;;  %vm1792_vm13 = vcmp.ge.f32.partialorder %v1771_v10, 0.0 }
0x15fa   :  { %v1824_v15 = vsel %vm1792_vm13, %v1771_v10, %v1808_v13 }
0x15fd   :  { %v1772_v60 = vpop.f32.mrf.mxu0 }
0x15fe   :  { %v1773_v5 = vadd.f32 %v2852_v62, %v1772_v60 }
0x1600   :  { %v1809_v11 = vmul.f32 0.01, %v1773_v5  ;;  %vm1793_vm12 = vcmp.ge.f32.partialorder %v1773_v5, 0.0 }
0x1602   :  { %v1825_v31 = vsel %vm1793_vm12, %v1773_v5, %v1809_v11 }
0x1605   :  { %v1775_v61 = vpop.f32.mrf.mxu0 }
0x1606   :  { %v1776_v43 = vadd.f32 %v2852_v62, %v1775_v61 }
0x1608   :  { %v1810_v7 = vmul.f32 0.01, %v1776_v43  ;;  %vm1794_vm11 = vcmp.ge.f32.partialorder %v1776_v43, 0.0 }
0x160a   :  { %v1826_v1 = vsel %vm1794_vm11, %v1776_v43, %v1810_v7 }
0x160d   :  { %v1777_v0 = vpop.f32.mrf.mxu0 }
0x160e   :  { %v1778_v2 = vadd.f32 %v2852_v62, %v1777_v0 }
0x1610   :  { %vm1795_vm5 = vcmp.ge.f32.partialorder %v1778_v2, 0.0  ;;  %v1811_v4 = vmul.f32 0.01, %v1778_v2 }
0x1612   :  { %v1827_v63 = vsel %vm1795_vm5, %v1778_v2, %v1811_v4  ;;  %vm1780_vm5 = vcmp.ge.f32.partialorder %v1741_v9, 0.0 }
0x1613   :  { %2073 = vmatpush.xpose.msk.msrb.mxu1 %vm1520_vm2, %v1827_v63  ;;  %v1812_v29 = vsel %vm1780_vm5, %v1741_v9, %v1796_v25 }
0x1617   :  { %2074 = vmatpush.xpose.msk.msrb.mxu1 %vm1520_vm2, %v1826_v1 }
0x161b   :  { %2075 = vmatpush.xpose.msk.msrb.mxu1 %vm1520_vm2, %v1825_v31 }
0x161f   :  { %2076 = vmatpush.xpose.msk.msrb.mxu1 %vm1520_vm2, %v1824_v15 }
0x1623   :  { %2077 = vmatpush.xpose.msk.msrb.mxu1 %vm1520_vm2, %v1823_v47 }
0x1627   :  { %2078 = vmatpush.xpose.msk.msrb.mxu1 %vm1520_vm2, %v1822_v37 }
0x162b   :  { %2079 = vmatpush.xpose.msk.msrb.mxu1 %vm1520_vm2, %v1821_v33 }
0x162f   :  { %2080 = vmatpush.xpose.msk.msrb.mxu1 %vm1520_vm2, %v1820_v55 }
0x1633   :  { %2081 = vmatpush.xpose.msk.msrb.mxu1 %vm1520_vm2, %v1819_v58 }
0x1637   :  { %2082 = vmatpush.xpose.msk.msrb.mxu1 %vm1520_vm2, %v1818_v50 }
0x163b   :  { %2083 = vmatpush.xpose.msk.msrb.mxu1 %vm1520_vm2, %v1817_v19 }
0x163f   :  { %2084 = vmatpush.xpose.msk.msrb.mxu1 %vm1520_vm2, %v1816_v22 }
0x1643   :  { %2085 = vmatpush.xpose.msk.msrb.mxu1 %vm1520_vm2, %v1815_v56 }
0x1647   :  { %2086 = vmatpush.xpose.msk.msrb.mxu1 %vm1520_vm2, %v1814_v24 }
0x164b   :  { %2087 = vmatpush.xpose.msk.msrb.mxu1 %vm1520_vm2, %v1813_v28 }
0x164f   :  { %2088 = vmatpush.xpose.msk.msrb.mxu1 %vm1520_vm2, %v1812_v29 }
0x1652   :  { %2089 = vmatmul.msk.f32.vlgmr.msrb.gmra.mxu1 %vm1520_vm2, %v1828_v27 }
0x16cf   :  { %v1904_v41 = vpop.f32.mrf.mxu1 }
0x16d0   :  { %v1905_v38 = vadd.f32 %v1904_v41, %v1835_v32 }
0x16d2   :  { %vm1907_vm11 = vcmp.ge.f32.partialorder %v1905_v38, 0.0  ;;  %v1908_v42 = vmul.f32 0.01, %v1905_v38 }
0x16d4   :  { %v1909_v44 = vsel %vm1907_vm11, %v1905_v38, %v1908_v42 }
0x16d5   :  { %1910 = vst [vmem:[#allocation5] sm:$0x1] %v1909_v44 }
0x16d6   :  { %1921 = dma.vmem_to_hbm [thread:$0]  %s1917_s0, 16, %s1919_s19, [#allocation6]  }
0x16d7   :  { %2277 = dma.done.wait [#allocation6], 16  }
0x16d8   :  { %2278 = vsyncadd [#allocation6], 4294967280 }
0x16d9   :  { %1926 = vsyncpa [#allocation6], 1 }

</bundles_post_ra>
